<compile_context>
chip_gen: v5e
topology: v5e:2x2
jax: 0.10.0
libtpu: 0.0.40
codegen_flags: <defaults>
</compile_context>

<pallas_src>
import functools
import math

import jax
import jax.numpy as jnp
import numpy as np
from jax.experimental import pallas as pl
from jax.experimental.pallas import tpu as pltpu

B, S, D, H, FFN_HIDDEN = 2, 8, 32, 4, 64
HD = D // H           # head_dim = 8
R = B * S             # batch folded into rows = 16
EPS = 1e-5
NEG = -1e9            # additive mask value (same magnitude as the causal mask)


# ----------------------------- fused kernel -----------------------------

def _decoder_layer_kernel(x_ref, y_ref, mask_ref, fold_ref,
                          wsa_ref, wsb_ref, wsc_ref, bias_ref,
                          o_ref, stk_ref,
                          *, batch, seq, d_model, num_heads, head_dim,
                          ffn_hidden, eps):
  rows = batch * seq

  # ---- fold batch into rows: (B, S, D) -> (B*S, D) ----
  xf = jnp.concatenate([x_ref[b] for b in range(batch)], axis=0)
  yf = jnp.concatenate([y_ref[b] for b in range(batch)], axis=0)

  def brow(r, n):                       # bias-slab row r, first n lanes
    return bias_ref[r:r + 1, 0:n]       # (1, n), broadcasts over rows

  def softmax(s):
    m = jnp.max(s, axis=-1, keepdims=True)
    e = jnp.exp(s - m)
    return e * pl.reciprocal(jnp.sum(e, axis=-1, keepdims=True), approx=True)

  def layer_norm(z, g, bb):
    mu = jnp.mean(z, axis=-1, keepdims=True)
    c = z - mu
    var = jnp.mean(c * c, axis=-1, keepdims=True)
    return g * (c * jax.lax.rsqrt(var + eps)) + bb

  # masks: batch-block-diagonal keeps the folded batches independent
  fold = fold_ref[...]                                          # (R, R)
  m = mask_ref[...]                                             # (S, S)
  m_row = jnp.concatenate([m] * batch, axis=1)                  # (S, R)
  self_mask = jnp.concatenate([m_row] * batch, axis=0) + fold   # (R, R)

  # ---------------- masked self-attention on y ----------------
  # fused qkv projection; softmax scale pre-folded into the Q columns.
  qkv = jnp.dot(yf, wsa_ref[:, 0:3 * d_model],
                preferred_element_type=jnp.float32) + brow(0, 3 * d_model)
  for h in range(num_heads):
    q = qkv[:, h * head_dim:(h + 1) * head_dim]
    k = qkv[:, d_model + h * head_dim:d_model + (h + 1) * head_dim]
    v = qkv[:, 2 * d_model + h * head_dim:2 * d_model + (h + 1) * head_dim]
    s = jax.lax.dot_general(q, k, (((1,), (1,)), ((), ())),
                            preferred_element_type=jnp.float32) + self_mask
    val = jnp.dot(softmax(s), v, preferred_element_type=jnp.float32)  # (R, hd)
    # store per-head values in (batch, head, seq) row order
    for b in range(batch):
      stk_ref[pl.ds(b * num_heads * seq + h * seq, seq), :] = (
          val[b * seq:(b + 1) * seq, :])

  # The module reshapes (B,H,S,hd)->(B,S,D) WITHOUT the head transpose.
  # With (b,h,s) row order in the scratch this bug is exactly:
  #   sa[r, :] = sum_j stk[r*H + j, :] @ Wo1[j*hd:(j+1)*hd, :]
  # i.e. four strided sublane reads (stride = num_heads).
  wo1 = wsb_ref[:, 2 * d_model:3 * d_model]                     # (D, D)
  sa = jnp.zeros((rows, d_model), jnp.float32)
  for j in range(num_heads):
    part = stk_ref[pl.ds(j, rows, stride=num_heads), :]         # (R, hd)
    sa = sa + jnp.dot(part, wo1[j * head_dim:(j + 1) * head_dim, :],
                      preferred_element_type=jnp.float32)
  sa = sa + brow(3, d_model)
  y1 = layer_norm(sa + yf, brow(7, d_model), brow(8, d_model))

  # ---------------- cross attention (k,v from x; q from y1; mask=None) ----
  kv = jnp.dot(xf, wsb_ref[:, 0:2 * d_model],
               preferred_element_type=jnp.float32) + brow(1, 2 * d_model)
  q2 = jnp.dot(y1, wsa_ref[:, 3 * d_model:4 * d_model],
               preferred_element_type=jnp.float32) + brow(2, d_model)
  wo2 = wsb_ref[:, 3 * d_model:4 * d_model]                     # (D, D)
  ca = jnp.zeros((rows, d_model), jnp.float32)
  for h in range(num_heads):
    k = kv[:, h * head_dim:(h + 1) * head_dim]
    v = kv[:, d_model + h * head_dim:d_model + (h + 1) * head_dim]
    q = q2[:, h * head_dim:(h + 1) * head_dim]
    s = jax.lax.dot_general(q, k, (((1,), (1,)), ((), ())),
                            preferred_element_type=jnp.float32) + fold
    val = jnp.dot(softmax(s), v, preferred_element_type=jnp.float32)
    ca = ca + jnp.dot(val, wo2[h * head_dim:(h + 1) * head_dim, :],
                      preferred_element_type=jnp.float32)
  ca = ca + brow(4, d_model)
  y2 = layer_norm(ca + y1, brow(9, d_model), brow(10, d_model))

  # ---------------- feed forward ----------------
  hid = jnp.maximum(
      jnp.dot(y2, wsc_ref[:, 0:ffn_hidden],
              preferred_element_type=jnp.float32) + brow(5, ffn_hidden), 0.0)
  w2t = wsc_ref[:, ffn_hidden:2 * ffn_hidden]                   # W2^T (D, FFN)
  ff = jax.lax.dot_general(hid, w2t, (((1,), (1,)), ((), ())),
                           preferred_element_type=jnp.float32) + brow(6, d_model)
  y3 = layer_norm(ff + y2, brow(11, d_model), brow(12, d_model))

  for b in range(batch):
    o_ref[b] = y3[b * seq:(b + 1) * seq, :]


# ------------------ one-time (hoisted) weight packing ------------------

def pack_params(params):
  """Reorder/scale/concatenate the module weights into lane-dense slabs.

  Runs ONCE outside the jitted forward path (numpy, host side)."""
  scale = 1.0 / math.sqrt(HD)
  p = {k: np.asarray(v, np.float32) for k, v in params.items()}

  # column reorder: old col h*(n*hd) + t*hd + e -> new col t*D + h*hd + e
  perm_qkv = np.empty((3 * D,), np.int32)
  perm_kv = np.empty((2 * D,), np.int32)
  for t in range(3):
    for h in range(H):
      for e in range(HD):
        perm_qkv[t * D + h * HD + e] = h * 3 * HD + t * HD + e
  for t in range(2):
    for h in range(H):
      for e in range(HD):
        perm_kv[t * D + h * HD + e] = h * 2 * HD + t * HD + e

  wqkv = p["Wqkv"][:, perm_qkv].copy()
  bqkv = p["bqkv"][perm_qkv].copy()
  wqkv[:, :D] *= scale            # fold softmax scale into the Q block
  bqkv[:D] *= scale
  wkv = p["Wkv"][:, perm_kv]
  bkv = p["bkv"][perm_kv]
  wq2 = p["Wq"] * scale
  bq2 = p["bq"] * scale

  ws_a = np.concatenate([wqkv, wq2], axis=1)                     # (32, 128)
  ws_b = np.concatenate([wkv, p["Wo1"], p["Wo2"]], axis=1)       # (32, 128)
  ws_c = np.concatenate([p["W1"], p["W2"].T], axis=1)            # (32, 128)

  bias = np.zeros((16, 128), np.float32)
  rows = [bqkv, bkv, bq2, p["bo1"], p["bo2"], p["b1"], p["b2"],
          p["g1"], p["beta1"], p["g2"], p["beta2"], p["g3"], p["beta3"]]
  for r, v in enumerate(rows):
    bias[r, :v.shape[0]] = v

  fold = np.full((R, R), NEG, np.float32)                        # batch blocks
  for b in range(B):
    fold[b * S:(b + 1) * S, b * S:(b + 1) * S] = 0.0

  return dict(ws_a=jnp.asarray(ws_a), ws_b=jnp.asarray(ws_b),
              ws_c=jnp.asarray(ws_c), bias=jnp.asarray(bias),
              fold=jnp.asarray(fold))


# ----------------------------- wrapper -----------------------------

def decoder_layer_forward(packed, x, y, mask):
  kern = functools.partial(_decoder_layer_kernel, batch=B, seq=S, d_model=D,
                           num_heads=H, head_dim=HD, ffn_hidden=FFN_HIDDEN,
                           eps=EPS)

  def full(shape):
    zeros = (0,) * len(shape)
    return pl.BlockSpec(shape, lambda i, z=zeros: z)

  return pl.pallas_call(
      kern,
      out_shape=jax.ShapeDtypeStruct((B, S, D), jnp.float32),
      grid=(1,),
      in_specs=[
          full((B, S, D)),            # x
          full((B, S, D)),            # y
          full((S, S)),               # decoder (causal) mask
          full((R, R)),               # batch-block additive mask (constant)
          full((D, 4 * D)),           # [Wqkv_perm*scaleQ | Wq*scale]
          full((D, 4 * D)),           # [Wkv_perm | Wo1 | Wo2]
          full((D, 2 * FFN_HIDDEN)),  # [W1 | W2^T]
          full((16, 128)),            # biases / gammas / betas (row each)
      ],
      out_specs=full((B, S, D)),
      scratch_shapes=[pltpu.VMEM((B * H * S, HD), jnp.float32)],
  )(x, y, mask, packed["fold"], packed["ws_a"], packed["ws_b"],
    packed["ws_c"], packed["bias"])


# ----------------------------- pure-JAX reference -----------------------------

def _ref_ln(z, g, b, eps=EPS):
  mean = z.mean(axis=-1, keepdims=True)
  var = ((z - mean) ** 2).mean(axis=-1, keepdims=True)
  return g * (z - mean) / jnp.sqrt(var + eps) + b


def _ref_scaled_product(q, k, v, mask=None):
  d_k = q.shape[-1]
  s = jnp.matmul(q, jnp.swapaxes(k, -1, -2)) / math.sqrt(d_k)
  if mask is not None:
    s = jnp.transpose(s, (1, 0, 2, 3)) + mask
    s = jnp.transpose(s, (1, 0, 2, 3))
  return jnp.matmul(jax.nn.softmax(s, axis=-1), v)


def reference_forward(params, x, y, mask):
  Bq, Sq, Dm = y.shape
  hd = Dm // H
  qkv = y @ params["Wqkv"] + params["bqkv"]
  qkv = qkv.reshape(Bq, Sq, H, 3 * hd).transpose(0, 2, 1, 3)
  q, k, v = jnp.split(qkv, 3, axis=-1)
  # NOTE: reproduces the module's reshape WITHOUT the head transpose.
  vals = _ref_scaled_product(q, k, v, mask).reshape(Bq, Sq, Dm)
  sa = vals @ params["Wo1"] + params["bo1"]
  y1 = _ref_ln(sa + y, params["g1"], params["beta1"])

  kv = x @ params["Wkv"] + params["bkv"]
  q2 = y1 @ params["Wq"] + params["bq"]
  kv = kv.reshape(Bq, Sq, H, 2 * hd).transpose(0, 2, 1, 3)
  q2 = q2.reshape(Bq, Sq, H, hd).transpose(0, 2, 1, 3)
  k2, v2 = jnp.split(kv, 2, axis=-1)
  vals2 = _ref_scaled_product(q2, k2, v2, None)
  vals2 = vals2.transpose(0, 2, 1, 3).reshape(Bq, Sq, Dm)
  ca = vals2 @ params["Wo2"] + params["bo2"]
  y2 = _ref_ln(ca + y1, params["g2"], params["beta2"])

  h = jnp.maximum(y2 @ params["W1"] + params["b1"], 0.0)
  ff = h @ params["W2"] + params["b2"]
  return _ref_ln(ff + y2, params["g3"], params["beta3"])


# ----------------------------- setup & run -----------------------------

def init_params(key):
  ks = jax.random.split(key, 14)

  def w(i, shape):
    return jax.random.normal(ks[i], shape, jnp.float32) * 0.05

  return dict(
      Wqkv=w(0, (D, 3 * D)), bqkv=w(1, (3 * D,)),
      Wo1=w(2, (D, D)), bo1=w(3, (D,)),
      g1=jnp.ones((D,), jnp.float32), beta1=jnp.zeros((D,), jnp.float32),
      Wkv=w(4, (D, 2 * D)), bkv=w(5, (2 * D,)),
      Wq=w(6, (D, D)), bq=w(7, (D,)),
      Wo2=w(8, (D, D)), bo2=w(9, (D,)),
      g2=jnp.ones((D,), jnp.float32), beta2=jnp.zeros((D,), jnp.float32),
      W1=w(10, (D, FFN_HIDDEN)), b1=w(11, (FFN_HIDDEN,)),
      W2=w(12, (FFN_HIDDEN, D)), b2=w(13, (D,)),
      g3=jnp.ones((D,), jnp.float32), beta3=jnp.zeros((D,), jnp.float32),
  )


if __name__ == "__main__":
  key = jax.random.PRNGKey(0)
  kp, kx, ky = jax.random.split(key, 3)
  params = init_params(kp)
  x = jax.random.normal(kx, (B, S, D), jnp.float32)
  y = jax.random.normal(ky, (B, S, D), jnp.float32)
  # causal decoder mask, additive
  decoder_mask = jnp.where(jnp.triu(jnp.ones((S, S), jnp.bool_), k=1),
                           -1e9, 0.0).astype(jnp.float32)

  packed = pack_params(params)            # one-time, hoisted weight prep
  fwd = jax.jit(decoder_layer_forward)    # forward path = single pallas_call
  out = jax.block_until_ready(fwd(packed, x, y, decoder_mask))

  ref = reference_forward(params, x, y, decoder_mask)
  np.testing.assert_allclose(np.asarray(out), np.asarray(ref),
                             rtol=2e-2, atol=2e-2)
  print("KERNEL_OK")
</pallas_src>

<mosaic_0001>
module attributes {stable_mosaic.version = 11 : i64} {
  func.func @_decoder_layer_kernel(%arg0: i32, %arg1: memref<2x8x32xf32, #tpu.memory_space<vmem>>, %arg2: memref<2x8x32xf32, #tpu.memory_space<vmem>>, %arg3: memref<8x8xf32, #tpu.memory_space<vmem>>, %arg4: memref<16x16xf32, #tpu.memory_space<vmem>>, %arg5: memref<32x128xf32, #tpu.memory_space<vmem>>, %arg6: memref<32x128xf32, #tpu.memory_space<vmem>>, %arg7: memref<32x128xf32, #tpu.memory_space<vmem>>, %arg8: memref<16x128xf32, #tpu.memory_space<vmem>>, %arg9: memref<2x8x32xf32, #tpu.memory_space<vmem>>, %arg10: memref<64x8xf32, #tpu.memory_space<vmem>>) attributes {dimension_semantics = [#tpu.dimension_semantics<arbitrary>], iteration_bounds = array<i64: 1>, scalar_prefetch = 0 : i64, scratch_operands = 1 : i64, tpu.core_type = #tpu.core_type<tc>, window_params = [{pipeline_mode = #tpu.pipeline_mode<synchronous>, transform_indices = @transform_0, window_bounds = array<i64: 2, 8, 32>}, {pipeline_mode = #tpu.pipeline_mode<synchronous>, transform_indices = @transform_1, window_bounds = array<i64: 2, 8, 32>}, {pipeline_mode = #tpu.pipeline_mode<synchronous>, transform_indices = @transform_2, window_bounds = array<i64: 8, 8>}, {pipeline_mode = #tpu.pipeline_mode<synchronous>, transform_indices = @transform_3, window_bounds = array<i64: 16, 16>}, {pipeline_mode = #tpu.pipeline_mode<synchronous>, transform_indices = @transform_4, window_bounds = array<i64: 32, 128>}, {pipeline_mode = #tpu.pipeline_mode<synchronous>, transform_indices = @transform_5, window_bounds = array<i64: 32, 128>}, {pipeline_mode = #tpu.pipeline_mode<synchronous>, transform_indices = @transform_6, window_bounds = array<i64: 32, 128>}, {pipeline_mode = #tpu.pipeline_mode<synchronous>, transform_indices = @transform_7, window_bounds = array<i64: 16, 128>}, {pipeline_mode = #tpu.pipeline_mode<synchronous>, transform_indices = @transform_8, window_bounds = array<i64: 2, 8, 32>}]} {
    %c0 = arith.constant 0 : index
    %c0_0 = arith.constant 0 : index
    %c0_1 = arith.constant 0 : index
    %0 = vector.load %arg1[%c0, %c0_0, %c0_1] : memref<2x8x32xf32, #tpu.memory_space<vmem>>, vector<1x8x32xf32>
    %1 = vector.shape_cast %0 : vector<1x8x32xf32> to vector<8x32xf32>
    %c1 = arith.constant 1 : index
    %c0_2 = arith.constant 0 : index
    %c0_3 = arith.constant 0 : index
    %2 = vector.load %arg1[%c1, %c0_2, %c0_3] : memref<2x8x32xf32, #tpu.memory_space<vmem>>, vector<1x8x32xf32>
    %3 = vector.shape_cast %2 : vector<1x8x32xf32> to vector<8x32xf32>
    %4 = tpu.concatenate %1, %3 in 0 : vector<8x32xf32>, vector<8x32xf32> -> vector<16x32xf32>
    %c0_4 = arith.constant 0 : index
    %c0_5 = arith.constant 0 : index
    %c0_6 = arith.constant 0 : index
    %5 = vector.load %arg2[%c0_4, %c0_5, %c0_6] : memref<2x8x32xf32, #tpu.memory_space<vmem>>, vector<1x8x32xf32>
    %6 = vector.shape_cast %5 : vector<1x8x32xf32> to vector<8x32xf32>
    %c1_7 = arith.constant 1 : index
    %c0_8 = arith.constant 0 : index
    %c0_9 = arith.constant 0 : index
    %7 = vector.load %arg2[%c1_7, %c0_8, %c0_9] : memref<2x8x32xf32, #tpu.memory_space<vmem>>, vector<1x8x32xf32>
    %8 = vector.shape_cast %7 : vector<1x8x32xf32> to vector<8x32xf32>
    %9 = tpu.concatenate %6, %8 in 0 : vector<8x32xf32>, vector<8x32xf32> -> vector<16x32xf32>
    %c0_10 = arith.constant 0 : index
    %c0_11 = arith.constant 0 : index
    %10 = vector.load %arg4[%c0_10, %c0_11] : memref<16x16xf32, #tpu.memory_space<vmem>>, vector<16x16xf32>
    %c0_12 = arith.constant 0 : index
    %c0_13 = arith.constant 0 : index
    %11 = vector.load %arg3[%c0_12, %c0_13] : memref<8x8xf32, #tpu.memory_space<vmem>>, vector<8x8xf32>
    %12 = tpu.concatenate %11, %11 in 1 : vector<8x8xf32>, vector<8x8xf32> -> vector<8x16xf32>
    %13 = tpu.concatenate %12, %12 in 0 : vector<8x16xf32>, vector<8x16xf32> -> vector<16x16xf32>
    %14 = arith.addf %13, %10 : vector<16x16xf32>
    %c0_14 = arith.constant 0 : index
    %c0_15 = arith.constant 0 : index
    %15 = vector.load %arg5[%c0_14, %c0_15] : memref<32x128xf32, #tpu.memory_space<vmem>>, vector<32x96xf32>
    %cst = arith.constant dense<0.000000e+00> : vector<16x96xf32>
    %16 = tpu.matmul %9, %15, %cst {dimension_numbers = #tpu.dot_dimension_numbers<[1], [0], [0], [1], [0, 0, 1, 1], [], []>} : vector<16x32xf32>, vector<32x96xf32>, vector<16x96xf32> -> vector<16x96xf32>
    %c0_16 = arith.constant 0 : index
    %c0_17 = arith.constant 0 : index
    %17 = vector.load %arg8[%c0_16, %c0_17] : memref<16x128xf32, #tpu.memory_space<vmem>>, vector<1x96xf32>
    %18 = vector.broadcast %17 : vector<1x96xf32> to vector<16x96xf32>
    %19 = arith.addf %16, %18 : vector<16x96xf32>
    %20 = vector.extract_strided_slice %19 {offsets = [0, 0], sizes = [16, 8], strides = [1, 1]} : vector<16x96xf32> to vector<16x8xf32>
    %21 = vector.extract_strided_slice %19 {offsets = [0, 32], sizes = [16, 8], strides = [1, 1]} : vector<16x96xf32> to vector<16x8xf32>
    %22 = vector.extract_strided_slice %19 {offsets = [0, 64], sizes = [16, 8], strides = [1, 1]} : vector<16x96xf32> to vector<16x8xf32>
    %cst_18 = arith.constant dense<0.000000e+00> : vector<16x16xf32>
    %23 = tpu.matmul %20, %21, %cst_18 {dimension_numbers = #tpu.dot_dimension_numbers<[1], [1], [0], [0], [0, 0, 1, 0], [], []>} : vector<16x8xf32>, vector<16x8xf32>, vector<16x16xf32> -> vector<16x16xf32>
    %24 = arith.addf %23, %14 : vector<16x16xf32>
    %cst_19 = arith.constant dense<0xFF800000> : vector<16xf32>
    %25 = vector.multi_reduction <maximumf>, %24, %cst_19 [1] : vector<16x16xf32> to vector<16xf32>
    %26 = vector.shape_cast %25 : vector<16xf32> to vector<16x1xf32>
    %27 = vector.broadcast %26 : vector<16x1xf32> to vector<16x16xf32>
    %28 = arith.subf %24, %27 : vector<16x16xf32>
    %29 = math.exp %28 : vector<16x16xf32>
    %cst_20 = arith.constant dense<0.000000e+00> : vector<16xf32>
    %30 = vector.multi_reduction <add>, %29, %cst_20 [1] : vector<16x16xf32> to vector<16xf32>
    %31 = vector.shape_cast %30 : vector<16xf32> to vector<16x1xf32>
    %32 = tpu.reciprocal %31 {approx = true} : vector<16x1xf32> -> vector<16x1xf32>
    %33 = vector.broadcast %32 : vector<16x1xf32> to vector<16x16xf32>
    %34 = arith.mulf %29, %33 : vector<16x16xf32>
    %cst_21 = arith.constant dense<0.000000e+00> : vector<16x8xf32>
    %35 = tpu.matmul %34, %22, %cst_21 {dimension_numbers = #tpu.dot_dimension_numbers<[1], [0], [0], [1], [0, 0, 1, 1], [], []>} : vector<16x16xf32>, vector<16x8xf32>, vector<16x8xf32> -> vector<16x8xf32>
    %36 = vector.extract_strided_slice %35 {offsets = [0, 0], sizes = [8, 8], strides = [1, 1]} : vector<16x8xf32> to vector<8x8xf32>
    %c0_22 = arith.constant 0 : index
    %c0_23 = arith.constant 0 : index
    %37 = vector.load %arg10[%c0_22, %c0_23] : memref<64x8xf32, #tpu.memory_space<vmem>>, vector<8x8xf32>
    tpu.vector_store %arg10[%c0_22, %c0_23], %36 {strides = array<i32>} : memref<64x8xf32, #tpu.memory_space<vmem>>, vector<8x8xf32>,
    %38 = vector.extract_strided_slice %35 {offsets = [8, 0], sizes = [8, 8], strides = [1, 1]} : vector<16x8xf32> to vector<8x8xf32>
    %c32 = arith.constant 32 : index
    %c0_24 = arith.constant 0 : index
    %39 = vector.load %arg10[%c32, %c0_24] : memref<64x8xf32, #tpu.memory_space<vmem>>, vector<8x8xf32>
    tpu.vector_store %arg10[%c32, %c0_24], %38 {strides = array<i32>} : memref<64x8xf32, #tpu.memory_space<vmem>>, vector<8x8xf32>,
    %40 = vector.extract_strided_slice %19 {offsets = [0, 8], sizes = [16, 8], strides = [1, 1]} : vector<16x96xf32> to vector<16x8xf32>
    %41 = vector.extract_strided_slice %19 {offsets = [0, 40], sizes = [16, 8], strides = [1, 1]} : vector<16x96xf32> to vector<16x8xf32>
    %42 = vector.extract_strided_slice %19 {offsets = [0, 72], sizes = [16, 8], strides = [1, 1]} : vector<16x96xf32> to vector<16x8xf32>
    %cst_25 = arith.constant dense<0.000000e+00> : vector<16x16xf32>
    %43 = tpu.matmul %40, %41, %cst_25 {dimension_numbers = #tpu.dot_dimension_numbers<[1], [1], [0], [0], [0, 0, 1, 0], [], []>} : vector<16x8xf32>, vector<16x8xf32>, vector<16x16xf32> -> vector<16x16xf32>
    %44 = arith.addf %43, %14 : vector<16x16xf32>
    %cst_26 = arith.constant dense<0xFF800000> : vector<16xf32>
    %45 = vector.multi_reduction <maximumf>, %44, %cst_26 [1] : vector<16x16xf32> to vector<16xf32>
    %46 = vector.shape_cast %45 : vector<16xf32> to vector<16x1xf32>
    %47 = vector.broadcast %46 : vector<16x1xf32> to vector<16x16xf32>
    %48 = arith.subf %44, %47 : vector<16x16xf32>
    %49 = math.exp %48 : vector<16x16xf32>
    %cst_27 = arith.constant dense<0.000000e+00> : vector<16xf32>
    %50 = vector.multi_reduction <add>, %49, %cst_27 [1] : vector<16x16xf32> to vector<16xf32>
    %51 = vector.shape_cast %50 : vector<16xf32> to vector<16x1xf32>
    %52 = tpu.reciprocal %51 {approx = true} : vector<16x1xf32> -> vector<16x1xf32>
    %53 = vector.broadcast %52 : vector<16x1xf32> to vector<16x16xf32>
    %54 = arith.mulf %49, %53 : vector<16x16xf32>
    %cst_28 = arith.constant dense<0.000000e+00> : vector<16x8xf32>
    %55 = tpu.matmul %54, %42, %cst_28 {dimension_numbers = #tpu.dot_dimension_numbers<[1], [0], [0], [1], [0, 0, 1, 1], [], []>} : vector<16x16xf32>, vector<16x8xf32>, vector<16x8xf32> -> vector<16x8xf32>
    %56 = vector.extract_strided_slice %55 {offsets = [0, 0], sizes = [8, 8], strides = [1, 1]} : vector<16x8xf32> to vector<8x8xf32>
    %c8 = arith.constant 8 : index
    %c0_29 = arith.constant 0 : index
    %57 = vector.load %arg10[%c8, %c0_29] : memref<64x8xf32, #tpu.memory_space<vmem>>, vector<8x8xf32>
    tpu.vector_store %arg10[%c8, %c0_29], %56 {strides = array<i32>} : memref<64x8xf32, #tpu.memory_space<vmem>>, vector<8x8xf32>,
    %58 = vector.extract_strided_slice %55 {offsets = [8, 0], sizes = [8, 8], strides = [1, 1]} : vector<16x8xf32> to vector<8x8xf32>
    %c40 = arith.constant 40 : index
    %c0_30 = arith.constant 0 : index
    %59 = vector.load %arg10[%c40, %c0_30] : memref<64x8xf32, #tpu.memory_space<vmem>>, vector<8x8xf32>
    tpu.vector_store %arg10[%c40, %c0_30], %58 {strides = array<i32>} : memref<64x8xf32, #tpu.memory_space<vmem>>, vector<8x8xf32>,
    %60 = vector.extract_strided_slice %19 {offsets = [0, 16], sizes = [16, 8], strides = [1, 1]} : vector<16x96xf32> to vector<16x8xf32>
    %61 = vector.extract_strided_slice %19 {offsets = [0, 48], sizes = [16, 8], strides = [1, 1]} : vector<16x96xf32> to vector<16x8xf32>
    %62 = vector.extract_strided_slice %19 {offsets = [0, 80], sizes = [16, 8], strides = [1, 1]} : vector<16x96xf32> to vector<16x8xf32>
    %cst_31 = arith.constant dense<0.000000e+00> : vector<16x16xf32>
    %63 = tpu.matmul %60, %61, %cst_31 {dimension_numbers = #tpu.dot_dimension_numbers<[1], [1], [0], [0], [0, 0, 1, 0], [], []>} : vector<16x8xf32>, vector<16x8xf32>, vector<16x16xf32> -> vector<16x16xf32>
    %64 = arith.addf %63, %14 : vector<16x16xf32>
    %cst_32 = arith.constant dense<0xFF800000> : vector<16xf32>
    %65 = vector.multi_reduction <maximumf>, %64, %cst_32 [1] : vector<16x16xf32> to vector<16xf32>
    %66 = vector.shape_cast %65 : vector<16xf32> to vector<16x1xf32>
    %67 = vector.broadcast %66 : vector<16x1xf32> to vector<16x16xf32>
    %68 = arith.subf %64, %67 : vector<16x16xf32>
    %69 = math.exp %68 : vector<16x16xf32>
    %cst_33 = arith.constant dense<0.000000e+00> : vector<16xf32>
    %70 = vector.multi_reduction <add>, %69, %cst_33 [1] : vector<16x16xf32> to vector<16xf32>
    %71 = vector.shape_cast %70 : vector<16xf32> to vector<16x1xf32>
    %72 = tpu.reciprocal %71 {approx = true} : vector<16x1xf32> -> vector<16x1xf32>
    %73 = vector.broadcast %72 : vector<16x1xf32> to vector<16x16xf32>
    %74 = arith.mulf %69, %73 : vector<16x16xf32>
    %cst_34 = arith.constant dense<0.000000e+00> : vector<16x8xf32>
    %75 = tpu.matmul %74, %62, %cst_34 {dimension_numbers = #tpu.dot_dimension_numbers<[1], [0], [0], [1], [0, 0, 1, 1], [], []>} : vector<16x16xf32>, vector<16x8xf32>, vector<16x8xf32> -> vector<16x8xf32>
    %76 = vector.extract_strided_slice %75 {offsets = [0, 0], sizes = [8, 8], strides = [1, 1]} : vector<16x8xf32> to vector<8x8xf32>
    %c16 = arith.constant 16 : index
    %c0_35 = arith.constant 0 : index
    %77 = vector.load %arg10[%c16, %c0_35] : memref<64x8xf32, #tpu.memory_space<vmem>>, vector<8x8xf32>
    tpu.vector_store %arg10[%c16, %c0_35], %76 {strides = array<i32>} : memref<64x8xf32, #tpu.memory_space<vmem>>, vector<8x8xf32>,
    %78 = vector.extract_strided_slice %75 {offsets = [8, 0], sizes = [8, 8], strides = [1, 1]} : vector<16x8xf32> to vector<8x8xf32>
    %c48 = arith.constant 48 : index
    %c0_36 = arith.constant 0 : index
    %79 = vector.load %arg10[%c48, %c0_36] : memref<64x8xf32, #tpu.memory_space<vmem>>, vector<8x8xf32>
    tpu.vector_store %arg10[%c48, %c0_36], %78 {strides = array<i32>} : memref<64x8xf32, #tpu.memory_space<vmem>>, vector<8x8xf32>,
    %80 = vector.extract_strided_slice %19 {offsets = [0, 24], sizes = [16, 8], strides = [1, 1]} : vector<16x96xf32> to vector<16x8xf32>
    %81 = vector.extract_strided_slice %19 {offsets = [0, 56], sizes = [16, 8], strides = [1, 1]} : vector<16x96xf32> to vector<16x8xf32>
    %82 = vector.extract_strided_slice %19 {offsets = [0, 88], sizes = [16, 8], strides = [1, 1]} : vector<16x96xf32> to vector<16x8xf32>
    %cst_37 = arith.constant dense<0.000000e+00> : vector<16x16xf32>
    %83 = tpu.matmul %80, %81, %cst_37 {dimension_numbers = #tpu.dot_dimension_numbers<[1], [1], [0], [0], [0, 0, 1, 0], [], []>} : vector<16x8xf32>, vector<16x8xf32>, vector<16x16xf32> -> vector<16x16xf32>
    %84 = arith.addf %83, %14 : vector<16x16xf32>
    %cst_38 = arith.constant dense<0xFF800000> : vector<16xf32>
    %85 = vector.multi_reduction <maximumf>, %84, %cst_38 [1] : vector<16x16xf32> to vector<16xf32>
    %86 = vector.shape_cast %85 : vector<16xf32> to vector<16x1xf32>
    %87 = vector.broadcast %86 : vector<16x1xf32> to vector<16x16xf32>
    %88 = arith.subf %84, %87 : vector<16x16xf32>
    %89 = math.exp %88 : vector<16x16xf32>
    %cst_39 = arith.constant dense<0.000000e+00> : vector<16xf32>
    %90 = vector.multi_reduction <add>, %89, %cst_39 [1] : vector<16x16xf32> to vector<16xf32>
    %91 = vector.shape_cast %90 : vector<16xf32> to vector<16x1xf32>
    %92 = tpu.reciprocal %91 {approx = true} : vector<16x1xf32> -> vector<16x1xf32>
    %93 = vector.broadcast %92 : vector<16x1xf32> to vector<16x16xf32>
    %94 = arith.mulf %89, %93 : vector<16x16xf32>
    %cst_40 = arith.constant dense<0.000000e+00> : vector<16x8xf32>
    %95 = tpu.matmul %94, %82, %cst_40 {dimension_numbers = #tpu.dot_dimension_numbers<[1], [0], [0], [1], [0, 0, 1, 1], [], []>} : vector<16x16xf32>, vector<16x8xf32>, vector<16x8xf32> -> vector<16x8xf32>
    %96 = vector.extract_strided_slice %95 {offsets = [0, 0], sizes = [8, 8], strides = [1, 1]} : vector<16x8xf32> to vector<8x8xf32>
    %c24 = arith.constant 24 : index
    %c0_41 = arith.constant 0 : index
    %97 = vector.load %arg10[%c24, %c0_41] : memref<64x8xf32, #tpu.memory_space<vmem>>, vector<8x8xf32>
    tpu.vector_store %arg10[%c24, %c0_41], %96 {strides = array<i32>} : memref<64x8xf32, #tpu.memory_space<vmem>>, vector<8x8xf32>,
    %98 = vector.extract_strided_slice %95 {offsets = [8, 0], sizes = [8, 8], strides = [1, 1]} : vector<16x8xf32> to vector<8x8xf32>
    %c56 = arith.constant 56 : index
    %c0_42 = arith.constant 0 : index
    %99 = vector.load %arg10[%c56, %c0_42] : memref<64x8xf32, #tpu.memory_space<vmem>>, vector<8x8xf32>
    tpu.vector_store %arg10[%c56, %c0_42], %98 {strides = array<i32>} : memref<64x8xf32, #tpu.memory_space<vmem>>, vector<8x8xf32>,
    %c0_43 = arith.constant 0 : index
    %c64 = arith.constant 64 : index
    %100 = vector.load %arg6[%c0_43, %c64] : memref<32x128xf32, #tpu.memory_space<vmem>>, vector<32x32xf32>
    %cst_44 = arith.constant 0.000000e+00 : f32
    %101 = vector.broadcast %cst_44 : f32 to vector<16x32xf32>
    %c0_45 = arith.constant 0 : index
    %c0_46 = arith.constant 0 : index
    %102 = tpu.strided_load %arg10[%c0_45, %c0_46] {strides = array<i32: 4, 1>} : memref<64x8xf32, #tpu.memory_space<vmem>>, vector<16x8xf32>
    %103 = vector.extract_strided_slice %100 {offsets = [0, 0], sizes = [8, 32], strides = [1, 1]} : vector<32x32xf32> to vector<8x32xf32>
    %cst_47 = arith.constant dense<0.000000e+00> : vector<16x32xf32>
    %104 = tpu.matmul %102, %103, %cst_47 {dimension_numbers = #tpu.dot_dimension_numbers<[1], [0], [0], [1], [0, 0, 1, 1], [], []>} : vector<16x8xf32>, vector<8x32xf32>, vector<16x32xf32> -> vector<16x32xf32>
    %105 = arith.addf %101, %104 : vector<16x32xf32>
    %c1_48 = arith.constant 1 : index
    %c0_49 = arith.constant 0 : index
    %106 = tpu.strided_load %arg10[%c1_48, %c0_49] {strides = array<i32: 4, 1>} : memref<64x8xf32, #tpu.memory_space<vmem>>, vector<16x8xf32>
    %107 = vector.extract_strided_slice %100 {offsets = [8, 0], sizes = [8, 32], strides = [1, 1]} : vector<32x32xf32> to vector<8x32xf32>
    %cst_50 = arith.constant dense<0.000000e+00> : vector<16x32xf32>
    %108 = tpu.matmul %106, %107, %cst_50 {dimension_numbers = #tpu.dot_dimension_numbers<[1], [0], [0], [1], [0, 0, 1, 1], [], []>} : vector<16x8xf32>, vector<8x32xf32>, vector<16x32xf32> -> vector<16x32xf32>
    %109 = arith.addf %105, %108 : vector<16x32xf32>
    %c2 = arith.constant 2 : index
    %c0_51 = arith.constant 0 : index
    %110 = tpu.strided_load %arg10[%c2, %c0_51] {strides = array<i32: 4, 1>} : memref<64x8xf32, #tpu.memory_space<vmem>>, vector<16x8xf32>
    %111 = vector.extract_strided_slice %100 {offsets = [16, 0], sizes = [8, 32], strides = [1, 1]} : vector<32x32xf32> to vector<8x32xf32>
    %cst_52 = arith.constant dense<0.000000e+00> : vector<16x32xf32>
    %112 = tpu.matmul %110, %111, %cst_52 {dimension_numbers = #tpu.dot_dimension_numbers<[1], [0], [0], [1], [0, 0, 1, 1], [], []>} : vector<16x8xf32>, vector<8x32xf32>, vector<16x32xf32> -> vector<16x32xf32>
    %113 = arith.addf %109, %112 : vector<16x32xf32>
    %c3 = arith.constant 3 : index
    %c0_53 = arith.constant 0 : index
    %114 = tpu.strided_load %arg10[%c3, %c0_53] {strides = array<i32: 4, 1>} : memref<64x8xf32, #tpu.memory_space<vmem>>, vector<16x8xf32>
    %115 = vector.extract_strided_slice %100 {offsets = [24, 0], sizes = [8, 32], strides = [1, 1]} : vector<32x32xf32> to vector<8x32xf32>
    %cst_54 = arith.constant dense<0.000000e+00> : vector<16x32xf32>
    %116 = tpu.matmul %114, %115, %cst_54 {dimension_numbers = #tpu.dot_dimension_numbers<[1], [0], [0], [1], [0, 0, 1, 1], [], []>} : vector<16x8xf32>, vector<8x32xf32>, vector<16x32xf32> -> vector<16x32xf32>
    %117 = arith.addf %113, %116 : vector<16x32xf32>
    %c3_55 = arith.constant 3 : index
    %c0_56 = arith.constant 0 : index
    %118 = vector.load %arg8[%c3_55, %c0_56] : memref<16x128xf32, #tpu.memory_space<vmem>>, vector<1x32xf32>
    %119 = vector.broadcast %118 : vector<1x32xf32> to vector<16x32xf32>
    %120 = arith.addf %117, %119 : vector<16x32xf32>
    %121 = arith.addf %120, %9 : vector<16x32xf32>
    %c7 = arith.constant 7 : index
    %c0_57 = arith.constant 0 : index
    %122 = vector.load %arg8[%c7, %c0_57] : memref<16x128xf32, #tpu.memory_space<vmem>>, vector<1x32xf32>
    %c8_58 = arith.constant 8 : index
    %c0_59 = arith.constant 0 : index
    %123 = vector.load %arg8[%c8_58, %c0_59] : memref<16x128xf32, #tpu.memory_space<vmem>>, vector<1x32xf32>
    %cst_60 = arith.constant dense<0.000000e+00> : vector<16xf32>
    %124 = vector.multi_reduction <add>, %121, %cst_60 [1] : vector<16x32xf32> to vector<16xf32>
    %125 = vector.shape_cast %124 : vector<16xf32> to vector<16x1xf32>
    %cst_61 = arith.constant 3.200000e+01 : f32
    %126 = vector.broadcast %cst_61 : f32 to vector<16x1xf32>
    %127 = arith.divf %125, %126 : vector<16x1xf32>
    %128 = vector.broadcast %127 : vector<16x1xf32> to vector<16x32xf32>
    %129 = arith.subf %121, %128 : vector<16x32xf32>
    %130 = arith.mulf %129, %129 : vector<16x32xf32>
    %cst_62 = arith.constant dense<0.000000e+00> : vector<16xf32>
    %131 = vector.multi_reduction <add>, %130, %cst_62 [1] : vector<16x32xf32> to vector<16xf32>
    %132 = vector.shape_cast %131 : vector<16xf32> to vector<16x1xf32>
    %cst_63 = arith.constant 3.200000e+01 : f32
    %133 = vector.broadcast %cst_63 : f32 to vector<16x1xf32>
    %134 = arith.divf %132, %133 : vector<16x1xf32>
    %cst_64 = arith.constant 9.99999974E-6 : f32
    %135 = vector.broadcast %cst_64 : f32 to vector<16x1xf32>
    %136 = arith.addf %134, %135 : vector<16x1xf32>
    %137 = math.rsqrt %136 : vector<16x1xf32>
    %138 = vector.broadcast %137 : vector<16x1xf32> to vector<16x32xf32>
    %139 = arith.mulf %129, %138 : vector<16x32xf32>
    %140 = vector.broadcast %122 : vector<1x32xf32> to vector<16x32xf32>
    %141 = arith.mulf %140, %139 : vector<16x32xf32>
    %142 = vector.broadcast %123 : vector<1x32xf32> to vector<16x32xf32>
    %143 = arith.addf %141, %142 : vector<16x32xf32>
    %c0_65 = arith.constant 0 : index
    %c0_66 = arith.constant 0 : index
    %144 = vector.load %arg6[%c0_65, %c0_66] : memref<32x128xf32, #tpu.memory_space<vmem>>, vector<32x64xf32>
    %cst_67 = arith.constant dense<0.000000e+00> : vector<16x64xf32>
    %145 = tpu.matmul %4, %144, %cst_67 {dimension_numbers = #tpu.dot_dimension_numbers<[1], [0], [0], [1], [0, 0, 1, 1], [], []>} : vector<16x32xf32>, vector<32x64xf32>, vector<16x64xf32> -> vector<16x64xf32>
    %c1_68 = arith.constant 1 : index
    %c0_69 = arith.constant 0 : index
    %146 = vector.load %arg8[%c1_68, %c0_69] : memref<16x128xf32, #tpu.memory_space<vmem>>, vector<1x64xf32>
    %147 = vector.broadcast %146 : vector<1x64xf32> to vector<16x64xf32>
    %148 = arith.addf %145, %147 : vector<16x64xf32>
    %c0_70 = arith.constant 0 : index
    %c96 = arith.constant 96 : index
    %149 = vector.load %arg5[%c0_70, %c96] : memref<32x128xf32, #tpu.memory_space<vmem>>, vector<32x32xf32>
    %cst_71 = arith.constant dense<0.000000e+00> : vector<16x32xf32>
    %150 = tpu.matmul %143, %149, %cst_71 {dimension_numbers = #tpu.dot_dimension_numbers<[1], [0], [0], [1], [0, 0, 1, 1], [], []>} : vector<16x32xf32>, vector<32x32xf32>, vector<16x32xf32> -> vector<16x32xf32>
    %c2_72 = arith.constant 2 : index
    %c0_73 = arith.constant 0 : index
    %151 = vector.load %arg8[%c2_72, %c0_73] : memref<16x128xf32, #tpu.memory_space<vmem>>, vector<1x32xf32>
    %152 = vector.broadcast %151 : vector<1x32xf32> to vector<16x32xf32>
    %153 = arith.addf %150, %152 : vector<16x32xf32>
    %c0_74 = arith.constant 0 : index
    %c96_75 = arith.constant 96 : index
    %154 = vector.load %arg6[%c0_74, %c96_75] : memref<32x128xf32, #tpu.memory_space<vmem>>, vector<32x32xf32>
    %cst_76 = arith.constant 0.000000e+00 : f32
    %155 = vector.broadcast %cst_76 : f32 to vector<16x32xf32>
    %156 = vector.extract_strided_slice %148 {offsets = [0, 0], sizes = [16, 8], strides = [1, 1]} : vector<16x64xf32> to vector<16x8xf32>
    %157 = vector.extract_strided_slice %148 {offsets = [0, 32], sizes = [16, 8], strides = [1, 1]} : vector<16x64xf32> to vector<16x8xf32>
    %158 = vector.extract_strided_slice %153 {offsets = [0, 0], sizes = [16, 8], strides = [1, 1]} : vector<16x32xf32> to vector<16x8xf32>
    %cst_77 = arith.constant dense<0.000000e+00> : vector<16x16xf32>
    %159 = tpu.matmul %158, %156, %cst_77 {dimension_numbers = #tpu.dot_dimension_numbers<[1], [1], [0], [0], [0, 0, 1, 0], [], []>} : vector<16x8xf32>, vector<16x8xf32>, vector<16x16xf32> -> vector<16x16xf32>
    %160 = arith.addf %159, %10 : vector<16x16xf32>
    %cst_78 = arith.constant dense<0xFF800000> : vector<16xf32>
    %161 = vector.multi_reduction <maximumf>, %160, %cst_78 [1] : vector<16x16xf32> to vector<16xf32>
    %162 = vector.shape_cast %161 : vector<16xf32> to vector<16x1xf32>
    %163 = vector.broadcast %162 : vector<16x1xf32> to vector<16x16xf32>
    %164 = arith.subf %160, %163 : vector<16x16xf32>
    %165 = math.exp %164 : vector<16x16xf32>
    %cst_79 = arith.constant dense<0.000000e+00> : vector<16xf32>
    %166 = vector.multi_reduction <add>, %165, %cst_79 [1] : vector<16x16xf32> to vector<16xf32>
    %167 = vector.shape_cast %166 : vector<16xf32> to vector<16x1xf32>
    %168 = tpu.reciprocal %167 {approx = true} : vector<16x1xf32> -> vector<16x1xf32>
    %169 = vector.broadcast %168 : vector<16x1xf32> to vector<16x16xf32>
    %170 = arith.mulf %165, %169 : vector<16x16xf32>
    %cst_80 = arith.constant dense<0.000000e+00> : vector<16x8xf32>
    %171 = tpu.matmul %170, %157, %cst_80 {dimension_numbers = #tpu.dot_dimension_numbers<[1], [0], [0], [1], [0, 0, 1, 1], [], []>} : vector<16x16xf32>, vector<16x8xf32>, vector<16x8xf32> -> vector<16x8xf32>
    %172 = vector.extract_strided_slice %154 {offsets = [0, 0], sizes = [8, 32], strides = [1, 1]} : vector<32x32xf32> to vector<8x32xf32>
    %cst_81 = arith.constant dense<0.000000e+00> : vector<16x32xf32>
    %173 = tpu.matmul %171, %172, %cst_81 {dimension_numbers = #tpu.dot_dimension_numbers<[1], [0], [0], [1], [0, 0, 1, 1], [], []>} : vector<16x8xf32>, vector<8x32xf32>, vector<16x32xf32> -> vector<16x32xf32>
    %174 = arith.addf %155, %173 : vector<16x32xf32>
    %175 = vector.extract_strided_slice %148 {offsets = [0, 8], sizes = [16, 8], strides = [1, 1]} : vector<16x64xf32> to vector<16x8xf32>
    %176 = vector.extract_strided_slice %148 {offsets = [0, 40], sizes = [16, 8], strides = [1, 1]} : vector<16x64xf32> to vector<16x8xf32>
    %177 = vector.extract_strided_slice %153 {offsets = [0, 8], sizes = [16, 8], strides = [1, 1]} : vector<16x32xf32> to vector<16x8xf32>
    %cst_82 = arith.constant dense<0.000000e+00> : vector<16x16xf32>
    %178 = tpu.matmul %177, %175, %cst_82 {dimension_numbers = #tpu.dot_dimension_numbers<[1], [1], [0], [0], [0, 0, 1, 0], [], []>} : vector<16x8xf32>, vector<16x8xf32>, vector<16x16xf32> -> vector<16x16xf32>
    %179 = arith.addf %178, %10 : vector<16x16xf32>
    %cst_83 = arith.constant dense<0xFF800000> : vector<16xf32>
    %180 = vector.multi_reduction <maximumf>, %179, %cst_83 [1] : vector<16x16xf32> to vector<16xf32>
    %181 = vector.shape_cast %180 : vector<16xf32> to vector<16x1xf32>
    %182 = vector.broadcast %181 : vector<16x1xf32> to vector<16x16xf32>
    %183 = arith.subf %179, %182 : vector<16x16xf32>
    %184 = math.exp %183 : vector<16x16xf32>
    %cst_84 = arith.constant dense<0.000000e+00> : vector<16xf32>
    %185 = vector.multi_reduction <add>, %184, %cst_84 [1] : vector<16x16xf32> to vector<16xf32>
    %186 = vector.shape_cast %185 : vector<16xf32> to vector<16x1xf32>
    %187 = tpu.reciprocal %186 {approx = true} : vector<16x1xf32> -> vector<16x1xf32>
    %188 = vector.broadcast %187 : vector<16x1xf32> to vector<16x16xf32>
    %189 = arith.mulf %184, %188 : vector<16x16xf32>
    %cst_85 = arith.constant dense<0.000000e+00> : vector<16x8xf32>
    %190 = tpu.matmul %189, %176, %cst_85 {dimension_numbers = #tpu.dot_dimension_numbers<[1], [0], [0], [1], [0, 0, 1, 1], [], []>} : vector<16x16xf32>, vector<16x8xf32>, vector<16x8xf32> -> vector<16x8xf32>
    %191 = vector.extract_strided_slice %154 {offsets = [8, 0], sizes = [8, 32], strides = [1, 1]} : vector<32x32xf32> to vector<8x32xf32>
    %cst_86 = arith.constant dense<0.000000e+00> : vector<16x32xf32>
    %192 = tpu.matmul %190, %191, %cst_86 {dimension_numbers = #tpu.dot_dimension_numbers<[1], [0], [0], [1], [0, 0, 1, 1], [], []>} : vector<16x8xf32>, vector<8x32xf32>, vector<16x32xf32> -> vector<16x32xf32>
    %193 = arith.addf %174, %192 : vector<16x32xf32>
    %194 = vector.extract_strided_slice %148 {offsets = [0, 16], sizes = [16, 8], strides = [1, 1]} : vector<16x64xf32> to vector<16x8xf32>
    %195 = vector.extract_strided_slice %148 {offsets = [0, 48], sizes = [16, 8], strides = [1, 1]} : vector<16x64xf32> to vector<16x8xf32>
    %196 = vector.extract_strided_slice %153 {offsets = [0, 16], sizes = [16, 8], strides = [1, 1]} : vector<16x32xf32> to vector<16x8xf32>
    %cst_87 = arith.constant dense<0.000000e+00> : vector<16x16xf32>
    %197 = tpu.matmul %196, %194, %cst_87 {dimension_numbers = #tpu.dot_dimension_numbers<[1], [1], [0], [0], [0, 0, 1, 0], [], []>} : vector<16x8xf32>, vector<16x8xf32>, vector<16x16xf32> -> vector<16x16xf32>
    %198 = arith.addf %197, %10 : vector<16x16xf32>
    %cst_88 = arith.constant dense<0xFF800000> : vector<16xf32>
    %199 = vector.multi_reduction <maximumf>, %198, %cst_88 [1] : vector<16x16xf32> to vector<16xf32>
    %200 = vector.shape_cast %199 : vector<16xf32> to vector<16x1xf32>
    %201 = vector.broadcast %200 : vector<16x1xf32> to vector<16x16xf32>
    %202 = arith.subf %198, %201 : vector<16x16xf32>
    %203 = math.exp %202 : vector<16x16xf32>
    %cst_89 = arith.constant dense<0.000000e+00> : vector<16xf32>
    %204 = vector.multi_reduction <add>, %203, %cst_89 [1] : vector<16x16xf32> to vector<16xf32>
    %205 = vector.shape_cast %204 : vector<16xf32> to vector<16x1xf32>
    %206 = tpu.reciprocal %205 {approx = true} : vector<16x1xf32> -> vector<16x1xf32>
    %207 = vector.broadcast %206 : vector<16x1xf32> to vector<16x16xf32>
    %208 = arith.mulf %203, %207 : vector<16x16xf32>
    %cst_90 = arith.constant dense<0.000000e+00> : vector<16x8xf32>
    %209 = tpu.matmul %208, %195, %cst_90 {dimension_numbers = #tpu.dot_dimension_numbers<[1], [0], [0], [1], [0, 0, 1, 1], [], []>} : vector<16x16xf32>, vector<16x8xf32>, vector<16x8xf32> -> vector<16x8xf32>
    %210 = vector.extract_strided_slice %154 {offsets = [16, 0], sizes = [8, 32], strides = [1, 1]} : vector<32x32xf32> to vector<8x32xf32>
    %cst_91 = arith.constant dense<0.000000e+00> : vector<16x32xf32>
    %211 = tpu.matmul %209, %210, %cst_91 {dimension_numbers = #tpu.dot_dimension_numbers<[1], [0], [0], [1], [0, 0, 1, 1], [], []>} : vector<16x8xf32>, vector<8x32xf32>, vector<16x32xf32> -> vector<16x32xf32>
    %212 = arith.addf %193, %211 : vector<16x32xf32>
    %213 = vector.extract_strided_slice %148 {offsets = [0, 24], sizes = [16, 8], strides = [1, 1]} : vector<16x64xf32> to vector<16x8xf32>
    %214 = vector.extract_strided_slice %148 {offsets = [0, 56], sizes = [16, 8], strides = [1, 1]} : vector<16x64xf32> to vector<16x8xf32>
    %215 = vector.extract_strided_slice %153 {offsets = [0, 24], sizes = [16, 8], strides = [1, 1]} : vector<16x32xf32> to vector<16x8xf32>
    %cst_92 = arith.constant dense<0.000000e+00> : vector<16x16xf32>
    %216 = tpu.matmul %215, %213, %cst_92 {dimension_numbers = #tpu.dot_dimension_numbers<[1], [1], [0], [0], [0, 0, 1, 0], [], []>} : vector<16x8xf32>, vector<16x8xf32>, vector<16x16xf32> -> vector<16x16xf32>
    %217 = arith.addf %216, %10 : vector<16x16xf32>
    %cst_93 = arith.constant dense<0xFF800000> : vector<16xf32>
    %218 = vector.multi_reduction <maximumf>, %217, %cst_93 [1] : vector<16x16xf32> to vector<16xf32>
    %219 = vector.shape_cast %218 : vector<16xf32> to vector<16x1xf32>
    %220 = vector.broadcast %219 : vector<16x1xf32> to vector<16x16xf32>
    %221 = arith.subf %217, %220 : vector<16x16xf32>
    %222 = math.exp %221 : vector<16x16xf32>
    %cst_94 = arith.constant dense<0.000000e+00> : vector<16xf32>
    %223 = vector.multi_reduction <add>, %222, %cst_94 [1] : vector<16x16xf32> to vector<16xf32>
    %224 = vector.shape_cast %223 : vector<16xf32> to vector<16x1xf32>
    %225 = tpu.reciprocal %224 {approx = true} : vector<16x1xf32> -> vector<16x1xf32>
    %226 = vector.broadcast %225 : vector<16x1xf32> to vector<16x16xf32>
    %227 = arith.mulf %222, %226 : vector<16x16xf32>
    %cst_95 = arith.constant dense<0.000000e+00> : vector<16x8xf32>
    %228 = tpu.matmul %227, %214, %cst_95 {dimension_numbers = #tpu.dot_dimension_numbers<[1], [0], [0], [1], [0, 0, 1, 1], [], []>} : vector<16x16xf32>, vector<16x8xf32>, vector<16x8xf32> -> vector<16x8xf32>
    %229 = vector.extract_strided_slice %154 {offsets = [24, 0], sizes = [8, 32], strides = [1, 1]} : vector<32x32xf32> to vector<8x32xf32>
    %cst_96 = arith.constant dense<0.000000e+00> : vector<16x32xf32>
    %230 = tpu.matmul %228, %229, %cst_96 {dimension_numbers = #tpu.dot_dimension_numbers<[1], [0], [0], [1], [0, 0, 1, 1], [], []>} : vector<16x8xf32>, vector<8x32xf32>, vector<16x32xf32> -> vector<16x32xf32>
    %231 = arith.addf %212, %230 : vector<16x32xf32>
    %c4 = arith.constant 4 : index
    %c0_97 = arith.constant 0 : index
    %232 = vector.load %arg8[%c4, %c0_97] : memref<16x128xf32, #tpu.memory_space<vmem>>, vector<1x32xf32>
    %233 = vector.broadcast %232 : vector<1x32xf32> to vector<16x32xf32>
    %234 = arith.addf %231, %233 : vector<16x32xf32>
    %235 = arith.addf %234, %143 : vector<16x32xf32>
    %c9 = arith.constant 9 : index
    %c0_98 = arith.constant 0 : index
    %236 = vector.load %arg8[%c9, %c0_98] : memref<16x128xf32, #tpu.memory_space<vmem>>, vector<1x32xf32>
    %c10 = arith.constant 10 : index
    %c0_99 = arith.constant 0 : index
    %237 = vector.load %arg8[%c10, %c0_99] : memref<16x128xf32, #tpu.memory_space<vmem>>, vector<1x32xf32>
    %cst_100 = arith.constant dense<0.000000e+00> : vector<16xf32>
    %238 = vector.multi_reduction <add>, %235, %cst_100 [1] : vector<16x32xf32> to vector<16xf32>
    %239 = vector.shape_cast %238 : vector<16xf32> to vector<16x1xf32>
    %cst_101 = arith.constant 3.200000e+01 : f32
    %240 = vector.broadcast %cst_101 : f32 to vector<16x1xf32>
    %241 = arith.divf %239, %240 : vector<16x1xf32>
    %242 = vector.broadcast %241 : vector<16x1xf32> to vector<16x32xf32>
    %243 = arith.subf %235, %242 : vector<16x32xf32>
    %244 = arith.mulf %243, %243 : vector<16x32xf32>
    %cst_102 = arith.constant dense<0.000000e+00> : vector<16xf32>
    %245 = vector.multi_reduction <add>, %244, %cst_102 [1] : vector<16x32xf32> to vector<16xf32>
    %246 = vector.shape_cast %245 : vector<16xf32> to vector<16x1xf32>
    %cst_103 = arith.constant 3.200000e+01 : f32
    %247 = vector.broadcast %cst_103 : f32 to vector<16x1xf32>
    %248 = arith.divf %246, %247 : vector<16x1xf32>
    %cst_104 = arith.constant 9.99999974E-6 : f32
    %249 = vector.broadcast %cst_104 : f32 to vector<16x1xf32>
    %250 = arith.addf %248, %249 : vector<16x1xf32>
    %251 = math.rsqrt %250 : vector<16x1xf32>
    %252 = vector.broadcast %251 : vector<16x1xf32> to vector<16x32xf32>
    %253 = arith.mulf %243, %252 : vector<16x32xf32>
    %254 = vector.broadcast %236 : vector<1x32xf32> to vector<16x32xf32>
    %255 = arith.mulf %254, %253 : vector<16x32xf32>
    %256 = vector.broadcast %237 : vector<1x32xf32> to vector<16x32xf32>
    %257 = arith.addf %255, %256 : vector<16x32xf32>
    %c0_105 = arith.constant 0 : index
    %c0_106 = arith.constant 0 : index
    %258 = vector.load %arg7[%c0_105, %c0_106] : memref<32x128xf32, #tpu.memory_space<vmem>>, vector<32x64xf32>
    %cst_107 = arith.constant dense<0.000000e+00> : vector<16x64xf32>
    %259 = tpu.matmul %257, %258, %cst_107 {dimension_numbers = #tpu.dot_dimension_numbers<[1], [0], [0], [1], [0, 0, 1, 1], [], []>} : vector<16x32xf32>, vector<32x64xf32>, vector<16x64xf32> -> vector<16x64xf32>
    %c5 = arith.constant 5 : index
    %c0_108 = arith.constant 0 : index
    %260 = vector.load %arg8[%c5, %c0_108] : memref<16x128xf32, #tpu.memory_space<vmem>>, vector<1x64xf32>
    %261 = vector.broadcast %260 : vector<1x64xf32> to vector<16x64xf32>
    %262 = arith.addf %259, %261 : vector<16x64xf32>
    %cst_109 = arith.constant 0.000000e+00 : f32
    %263 = vector.broadcast %cst_109 : f32 to vector<16x64xf32>
    %264 = arith.maximumf %262, %263 : vector<16x64xf32>
    %c0_110 = arith.constant 0 : index
    %c64_111 = arith.constant 64 : index
    %265 = vector.load %arg7[%c0_110, %c64_111] : memref<32x128xf32, #tpu.memory_space<vmem>>, vector<32x64xf32>
    %cst_112 = arith.constant dense<0.000000e+00> : vector<16x32xf32>
    %266 = tpu.matmul %264, %265, %cst_112 {dimension_numbers = #tpu.dot_dimension_numbers<[1], [1], [0], [0], [0, 0, 1, 0], [], []>} : vector<16x64xf32>, vector<32x64xf32>, vector<16x32xf32> -> vector<16x32xf32>
    %c6 = arith.constant 6 : index
    %c0_113 = arith.constant 0 : index
    %267 = vector.load %arg8[%c6, %c0_113] : memref<16x128xf32, #tpu.memory_space<vmem>>, vector<1x32xf32>
    %268 = vector.broadcast %267 : vector<1x32xf32> to vector<16x32xf32>
    %269 = arith.addf %266, %268 : vector<16x32xf32>
    %270 = arith.addf %269, %257 : vector<16x32xf32>
    %c11 = arith.constant 11 : index
    %c0_114 = arith.constant 0 : index
    %271 = vector.load %arg8[%c11, %c0_114] : memref<16x128xf32, #tpu.memory_space<vmem>>, vector<1x32xf32>
    %c12 = arith.constant 12 : index
    %c0_115 = arith.constant 0 : index
    %272 = vector.load %arg8[%c12, %c0_115] : memref<16x128xf32, #tpu.memory_space<vmem>>, vector<1x32xf32>
    %cst_116 = arith.constant dense<0.000000e+00> : vector<16xf32>
    %273 = vector.multi_reduction <add>, %270, %cst_116 [1] : vector<16x32xf32> to vector<16xf32>
    %274 = vector.shape_cast %273 : vector<16xf32> to vector<16x1xf32>
    %cst_117 = arith.constant 3.200000e+01 : f32
    %275 = vector.broadcast %cst_117 : f32 to vector<16x1xf32>
    %276 = arith.divf %274, %275 : vector<16x1xf32>
    %277 = vector.broadcast %276 : vector<16x1xf32> to vector<16x32xf32>
    %278 = arith.subf %270, %277 : vector<16x32xf32>
    %279 = arith.mulf %278, %278 : vector<16x32xf32>
    %cst_118 = arith.constant dense<0.000000e+00> : vector<16xf32>
    %280 = vector.multi_reduction <add>, %279, %cst_118 [1] : vector<16x32xf32> to vector<16xf32>
    %281 = vector.shape_cast %280 : vector<16xf32> to vector<16x1xf32>
    %cst_119 = arith.constant 3.200000e+01 : f32
    %282 = vector.broadcast %cst_119 : f32 to vector<16x1xf32>
    %283 = arith.divf %281, %282 : vector<16x1xf32>
    %cst_120 = arith.constant 9.99999974E-6 : f32
    %284 = vector.broadcast %cst_120 : f32 to vector<16x1xf32>
    %285 = arith.addf %283, %284 : vector<16x1xf32>
    %286 = math.rsqrt %285 : vector<16x1xf32>
    %287 = vector.broadcast %286 : vector<16x1xf32> to vector<16x32xf32>
    %288 = arith.mulf %278, %287 : vector<16x32xf32>
    %289 = vector.broadcast %271 : vector<1x32xf32> to vector<16x32xf32>
    %290 = arith.mulf %289, %288 : vector<16x32xf32>
    %291 = vector.broadcast %272 : vector<1x32xf32> to vector<16x32xf32>
    %292 = arith.addf %290, %291 : vector<16x32xf32>
    %293 = vector.extract_strided_slice %292 {offsets = [0, 0], sizes = [8, 32], strides = [1, 1]} : vector<16x32xf32> to vector<8x32xf32>
    %c0_121 = arith.constant 0 : index
    %c0_122 = arith.constant 0 : index
    %c0_123 = arith.constant 0 : index
    %294 = vector.load %arg9[%c0_121, %c0_122, %c0_123] : memref<2x8x32xf32, #tpu.memory_space<vmem>>, vector<1x8x32xf32>
    %295 = vector.shape_cast %294 : vector<1x8x32xf32> to vector<8x32xf32>
    %296 = vector.shape_cast %293 : vector<8x32xf32> to vector<1x8x32xf32>
    tpu.vector_store %arg9[%c0_121, %c0_122, %c0_123], %296 {strides = array<i32>} : memref<2x8x32xf32, #tpu.memory_space<vmem>>, vector<1x8x32xf32>,
    %297 = vector.extract_strided_slice %292 {offsets = [8, 0], sizes = [8, 32], strides = [1, 1]} : vector<16x32xf32> to vector<8x32xf32>
    %c1_124 = arith.constant 1 : index
    %c0_125 = arith.constant 0 : index
    %c0_126 = arith.constant 0 : index
    %298 = vector.load %arg9[%c1_124, %c0_125, %c0_126] : memref<2x8x32xf32, #tpu.memory_space<vmem>>, vector<1x8x32xf32>
    %299 = vector.shape_cast %298 : vector<1x8x32xf32> to vector<8x32xf32>
    %300 = vector.shape_cast %297 : vector<8x32xf32> to vector<1x8x32xf32>
    tpu.vector_store %arg9[%c1_124, %c0_125, %c0_126], %300 {strides = array<i32>} : memref<2x8x32xf32, #tpu.memory_space<vmem>>, vector<1x8x32xf32>,
    return
  }
  func.func @transform_0(%arg0: i32) -> (i32, i32, i32) {
    %c0_i32 = arith.constant 0 : i32
    %c0_i32_0 = arith.constant 0 : i32
    %c0_i32_1 = arith.constant 0 : i32
    %c0_i32_2 = arith.constant 0 : i32
    return %c0_i32, %c0_i32_0, %c0_i32_1 : i32, i32, i32
  }
  func.func @transform_1(%arg0: i32) -> (i32, i32, i32) {
    %c0_i32 = arith.constant 0 : i32
    %c0_i32_0 = arith.constant 0 : i32
    %c0_i32_1 = arith.constant 0 : i32
    %c0_i32_2 = arith.constant 0 : i32
    return %c0_i32, %c0_i32_0, %c0_i32_1 : i32, i32, i32
  }
  func.func @transform_2(%arg0: i32) -> (i32, i32) {
    %c0_i32 = arith.constant 0 : i32
    %c0_i32_0 = arith.constant 0 : i32
    %c0_i32_1 = arith.constant 0 : i32
    return %c0_i32, %c0_i32_0 : i32, i32
  }
  func.func @transform_3(%arg0: i32) -> (i32, i32) {
    %c0_i32 = arith.constant 0 : i32
    %c0_i32_0 = arith.constant 0 : i32
    %c0_i32_1 = arith.constant 0 : i32
    return %c0_i32, %c0_i32_0 : i32, i32
  }
  func.func @transform_4(%arg0: i32) -> (i32, i32) {
    %c0_i32 = arith.constant 0 : i32
    %c0_i32_0 = arith.constant 0 : i32
    %c0_i32_1 = arith.constant 0 : i32
    return %c0_i32, %c0_i32_0 : i32, i32
  }
  func.func @transform_5(%arg0: i32) -> (i32, i32) {
    %c0_i32 = arith.constant 0 : i32
    %c0_i32_0 = arith.constant 0 : i32
    %c0_i32_1 = arith.constant 0 : i32
    return %c0_i32, %c0_i32_0 : i32, i32
  }
  func.func @transform_6(%arg0: i32) -> (i32, i32) {
    %c0_i32 = arith.constant 0 : i32
    %c0_i32_0 = arith.constant 0 : i32
    %c0_i32_1 = arith.constant 0 : i32
    return %c0_i32, %c0_i32_0 : i32, i32
  }
  func.func @transform_7(%arg0: i32) -> (i32, i32) {
    %c0_i32 = arith.constant 0 : i32
    %c0_i32_0 = arith.constant 0 : i32
    %c0_i32_1 = arith.constant 0 : i32
    return %c0_i32, %c0_i32_0 : i32, i32
  }
  func.func @transform_8(%arg0: i32) -> (i32, i32, i32) {
    %c0_i32 = arith.constant 0 : i32
    %c0_i32_0 = arith.constant 0 : i32
    %c0_i32_1 = arith.constant 0 : i32
    %c0_i32_2 = arith.constant 0 : i32
    return %c0_i32, %c0_i32_0, %c0_i32_1 : i32, i32, i32
  }
}

</mosaic_0001>

<bundles_post_ra>
// kernel: decoder_layer_forward.1
= control target key start
LH: loop header
LB: loop body
LE: loop exit
PB: predicated region body
PF: predicated region fallthrough
CT: control target
= control target key end

     0   :  { %13 = vsyncpa [#allocation4], 0  ;;  %s2570_s0 = inlined_call_operand.hbm [shape: f32[2,8,32], index: 0, kind: input, shape index: {}]   ;;  %s2571_s1 = inlined_call_operand.hbm [shape: f32[2,8,32], index: 1, kind: input, shape index: {}]   ;;  %s2572_s2 = inlined_call_operand.hbm [shape: f32[8,8], index: 2, kind: input, shape index: {}]   ;;  %s2573_s3 = inlined_call_operand.hbm [shape: f32[16,16], index: 3, kind: input, shape index: {}]   ;;  %s2574_s4 = inlined_call_operand.hbm [shape: f32[32,128], index: 4, kind: input, shape index: {}]   ;;  %s2575_s5 = inlined_call_operand.hbm [shape: f32[32,128], index: 5, kind: input, shape index: {}]   ;;  %s2576_s6 = inlined_call_operand.hbm [shape: f32[32,128], index: 6, kind: input, shape index: {}]   ;;  %s2577_s7 = inlined_call_operand.hbm [shape: f32[16,128], index: 7, kind: input, shape index: {}]   ;;  %s2578_s8 = inlined_call_operand.hbm [shape: f32[2,8,32], index: 8, kind: output, shape index: {}]  }
   0x1   :  { %14 = vsyncpa [#allocation7], 0 }
   0x2   :  { %15 = vsyncpa [#allocation10], 0 }
   0x3   :  { %16 = vsyncpa [#allocation13], 0 }
   0x4   :  { %17 = vsyncpa [#allocation16], 0 }
   0x5   :  { %18 = vsyncpa [#allocation5], 0  ;;  %s36_s29 = sshll.u32 %s2571_s1, 4  ;;  %s2121_s30 = smov [#allocation6]   ;;  %s37_s29 = int_to_ptr.hbm [resolvable:$true] %s36_s29 }
   0x6   :  { %s38_s9 = sshll.u32 %s2121_s30, 4  ;;  %s60_s12 = sshll.u32 %s2573_s3, 4  ;;  %s39_s9 = int_to_ptr.vmem [resolvable:$true] %s38_s9  ;;  %s61_s12 = int_to_ptr.hbm [resolvable:$true] %s60_s12 }
   0x7   :  { %s2122_s13 = smov 128   ;;  %s2123_s14 = smov 8  }
   0x8   :  { %44 = dma.hbm_to_vmem [thread:$0]  %s37_s29, 256, %s39_s9, [#allocation7], %s2122_s13, %s2122_s13, %s2123_s14  }
   0x9   :  { %s2124_s15 = smov [#allocation9]   ;;  %s86_s1 = sshll.u32 %s2575_s5, 4  ;;  %s87_s1 = int_to_ptr.hbm [resolvable:$true] %s86_s1 }
   0xa   :  { %s62_s16 = sshll.u32 %s2124_s15, 4  ;;  %s23_s20 = sshll.u32 %s2570_s0, 4  ;;  %s63_s16 = int_to_ptr.vmem [resolvable:$true] %s62_s16  ;;  %s24_s20 = int_to_ptr.hbm [resolvable:$true] %s23_s20 }
   0xb   :  { %68 = dma.hbm_to_vmem [thread:$0]  %s61_s12, 256, %s63_s16, [#allocation10], %s2122_s13, %s2122_s13, %s2123_s14  }
   0xc   :  { %s2125_s21 = smov [#allocation12]   ;;  %s2126_s23 = smov [#allocation3]  }
   0xd   :  { %s88_s22 = sshll.u32 %s2125_s21, 4  ;;  %s25_s5 = sshll.u32 %s2126_s23, 4  ;;  %s89_s22 = int_to_ptr.vmem [resolvable:$true] %s88_s22  ;;  %s26_s5 = int_to_ptr.vmem [resolvable:$true] %s25_s5 }
   0xe   :  { %94 = dma.hbm_to_vmem [thread:$0]  %s87_s1, 512, %s89_s22, [#allocation13], %s2122_s13, %s2122_s13, %s2123_s14  }
   0xf   :  { %s50_s26 = sshll.u32 %s2572_s2, 4  ;;  %s73_s28 = sshll.u32 %s2574_s4, 4  ;;  %s51_s26 = int_to_ptr.hbm [resolvable:$true] %s50_s26  ;;  %s74_s28 = int_to_ptr.hbm [resolvable:$true] %s73_s28 }
  0x10   :  { %31 = dma.hbm_to_vmem [thread:$0]  %s24_s20, 256, %s26_s5, [#allocation4], %s2122_s13, %s2122_s13, %s2123_s14  }
  0x11   :  { %s2127_s29 = smov [#allocation8]   ;;  %s2128_s9 = smov [#allocation11]  }
  0x12   :  { %s52_s30 = sshll.u32 %s2127_s29, 4  ;;  %s75_s10 = sshll.u32 %s2128_s9, 4  ;;  %s53_s30 = int_to_ptr.vmem [resolvable:$true] %s52_s30  ;;  %s76_s10 = int_to_ptr.vmem [resolvable:$true] %s75_s10 }
  0x13   :  { %55 = dma.hbm_to_vmem [thread:$0]  %s51_s26, 128, %s53_s30, [#allocation7]  }
  0x14   :  { %s99_s2 = sshll.u32 %s2576_s6, 4  ;;  %s112_s4 = sshll.u32 %s2577_s7, 4  ;;  %s100_s2 = int_to_ptr.hbm [resolvable:$true] %s99_s2  ;;  %s113_s4 = int_to_ptr.hbm [resolvable:$true] %s112_s4 }
  0x15   :  { %81 = dma.hbm_to_vmem [thread:$0]  %s74_s28, 512, %s76_s10, [#allocation10], %s2122_s13, %s2122_s13, %s2123_s14  }
  0x16   :  { %s2129_s17 = smov [#allocation14]   ;;  %s2130_s1 = smov [#allocation15]  }
  0x17   :  { %s101_s18 = sshll.u32 %s2129_s17, 4  ;;  %s114_s6 = sshll.u32 %s2130_s1, 4  ;;  %s102_s18 = int_to_ptr.vmem [resolvable:$true] %s101_s18  ;;  %s115_s6 = int_to_ptr.vmem [resolvable:$true] %s114_s6 }
  0x18   :  { %107 = dma.hbm_to_vmem [thread:$0]  %s100_s2, 512, %s102_s18, [#allocation13], %s2122_s13, %s2122_s13, %s2123_s14  }
  0x19   :  { %120 = dma.hbm_to_vmem [thread:$0]  %s113_s4, 256, %s115_s6, [#allocation16], %s2122_s13, %s2122_s13, %s2123_s14  }
  0x1a   :  { %2109 = dma.done.wait [#allocation4], 256  }
  0x1b   :  { %2110 = vsyncadd [#allocation4], 4294967040 }
  0x1c   :  { %2111 = dma.done.wait [#allocation7], 384  }
  0x1d   :  { %2112 = vsyncadd [#allocation7], 4294966912 }
  0x1e   :  { %2113 = dma.done.wait [#allocation10], 768  }
  0x1f   :  { %2114 = vsyncadd [#allocation10], 4294966528 }
  0x20   :  { %2115 = dma.done.wait [#allocation13], 1024  }
  0x21   :  { %2116 = vsyncadd [#allocation13], 4294966272 }
  0x22   :  { %2117 = dma.done.wait [#allocation16], 256  }
  0x23   :  { %2118 = vsyncadd [#allocation16], 4294967040  ;;  %v2235_v0 = vld [vmem:[#allocation11 + $0x18] sm:$0xff]  ;;  %v2237_v1 = vld [vmem:[#allocation11 + $0x10] sm:$0xff]  ;;  %vm176_vm0 = vcmask 261120   ;;  %s2131_s7 = smov 88  }
  0x24   :  { %195 = vmatpush.msra.mxu0 %v2235_v0  ;;  %v2240_v2 = vld [vmem:[#allocation11 + $0x8] sm:$0xff]  ;;  %v2242_v3 = vld [vmem:[#allocation11] sm:$0xff]  ;;  %v2245_v4 = vld [vmem:[#allocation6] sm:$0xff]  ;;  %s2132_s3 = smov 96   ;;  %s2133_s19 = smov 120   ;;  %vm166_vm1 = vcmask 64512  }
  0x25   :  { %v2251_v5 = vld [vmem:[#allocation6 + $0x8] sm:$0xff]  ;;  %s2134_s20 = smov 72   ;;  %s2135_s21 = smov 104   ;;  %v161_v14 = vld [vmem:[#allocation8] sm:$0xff]  ;;  %v2304_v27 = vld [vmem:[#allocation9] sm:$0xff]  ;;  %vm243_vm2 = vcmask 130048  }
  0x26   :  { %196 = vmatpush.msra.mxu0 %v2237_v1  ;;  %v1802_v7 = vld [vmem:[#allocation15] ss:$0 sm:$0xff]  ;;  %s2136_s22 = smov 64   ;;  %s2137_s23 = smov 80   ;;  %163 = vrot.lane.b32.xlu1 %v161_v14, %s2123_s14  ;;  %v2316_v36 = vld [vmem:[#allocation9 + $0x8] sm:$0xff] }
  0x27   :  { %s2138_s5 = smov 112   ;;  %s2139_s24 = smov 40  }
  0x28   :  { %197 = vmatpush.msra.mxu0 %v2240_v2  ;;  %s2140_s25 = smov 56   ;;  %s2141_s26 = smov 48  }
  0x29   :  { %s2143_s0 = smov 32   ;;  %s2144_s27 = smov [#allocation17]  }
  0x2a   :  { %198 = vmatpush.msra.mxu0 %v2242_v3  ;;  %s1619_s28 = sshll.u32 %s2144_s27, 4  ;;  %s1621_s9 = sshll.u32 %s2578_s8, 4  ;;  %s1620_s28 = int_to_ptr.vmem [resolvable:$true] %s1619_s28  ;;  %s1622_s9 = int_to_ptr.hbm [resolvable:$true] %s1621_s9 }
  0x2b   :  { %1638 = vmatmul.msk.f32.vlgmr.msra.gmra.mxu0 %vm176_vm0, %v2245_v4 }
  0x33   :  { %1639 = vmatmul.msk.f32.gmra.mxu0 %vm176_vm0, %v2251_v5 }
  0x98   :  { %v164_v26 = vpop.permute.xlu1 %163 }
  0x99   :  { %v167_v28 = vsel %vm166_vm1, %v161_v14, %v164_v26 }
  0x9a   :  { %v2308_v29 = vadd.f32 %v167_v28, %v2304_v27  ;;  %v2319_v39 = vadd.f32 %v167_v28, %v2316_v36 }
  0xa8   :  { %v200_v6 = vpop.f32.mrf.mxu0 }
  0xa9   :  { %v2261_v10 = vadd.f32 %v1802_v7, %v200_v6 }
  0xb0   :  { %v203_v8 = vpop.f32.mrf.mxu0 }
  0xb1   :  { %v2255_v9 = vadd.f32 %v1802_v7, %v203_v8 }
  0xb3   :  { %309 = vrot.lane.b32.xlu2 %v2255_v9, %s2131_s7  ;;  %210 = vrot.lane.b32.xlu0 %v2255_v9, %s2132_s3  ;;  %v2279_v11 = vpack.i.bf16 %v2261_v10, %v2255_v9 }
  0xbb   :  { %307 = vrot.lane.b32.xlu2 %v2261_v10, %s2131_s7  ;;  %208 = vrot.lane.b32.xlu0 %v2261_v10, %s2132_s3 }
  0xc3   :  { %305 = vrot.lane.b32.xlu2 %v2255_v9, %s2133_s19  ;;  %303 = vrot.lane.b32.xlu0 %v2261_v10, %s2133_s19 }
  0xcb   :  { %505 = vrot.lane.b32.xlu0 %v2255_v9, %s2134_s20 }
  0xd3   :  { %503 = vrot.lane.b32.xlu0 %v2261_v10, %s2134_s20 }
  0xdb   :  { %499 = vrot.lane.b32.xlu0 %v2261_v10, %s2135_s21 }
  0xe3   :  { %1743 = vrot.lane.b32.xlu0 %v2279_v11, %s2136_s22 }
  0xeb   :  { %501 = vrot.lane.b32.xlu0 %v2255_v9, %s2135_s21 }
  0xf3   :  { %405 = vrot.lane.b32.xlu0 %v2261_v10, %s2137_s23 }
  0xfb   :  { %403 = vrot.lane.b32.xlu0 %v2255_v9, %s2138_s5 }
 0x10d   :  { %v310_v12 = vpop.permute.xlu2 %309 }
 0x10e   :  { %1646 = vmatpush.xpose.msk.msra.mxu3 %vm166_vm1, %v310_v12 }
 0x115   :  { %v308_v13 = vpop.permute.xlu2 %307 }
 0x116   :  { %1647 = vmatpush.xpose.msk.msra.mxu3 %vm166_vm1, %v308_v13 }
 0x11d   :  { %v306_v18 = vpop.permute.xlu2 %305 }
 0x125   :  { %v211_v15 = vpop.permute.xlu0 %210 }
 0x126   :  { %1640 = vmatpush.xpose.msk.msra.mxu1 %vm166_vm1, %v211_v15 }
 0x12d   :  { %v209_v16 = vpop.permute.xlu0 %208 }
 0x12e   :  { %1641 = vmatpush.xpose.msk.msra.mxu1 %vm166_vm1, %v209_v16 }
 0x131   :  { %1642 = vmatmul.msk.f32.vlgmr.msra.gmra.mxu1 %vm166_vm1, %v2261_v10 }
 0x135   :  { %v304_v17 = vpop.permute.xlu0 %303 }
 0x136   :  { %1648 = vmatmul.msk.f32.vlgmr.msra.gmra.mxu3 %vm166_vm1, %v304_v17 }
 0x139   :  { %1643 = vmatmul.msk.f32.gmra.mxu1 %vm166_vm1, %v2255_v9 }
 0x13d   :  { %v506_v19 = vpop.permute.xlu0 %505 }
 0x13e   :  { %1649 = vmatmul.msk.f32.gmra.mxu3 %vm166_vm1, %v306_v18 }
 0x13f   :  { %1658 = vmatpush.xpose.msk.msrb.mxu3 %vm166_vm1, %v506_v19 }
 0x145   :  { %v504_v20 = vpop.permute.xlu0 %503 }
 0x146   :  { %1659 = vmatpush.xpose.msk.msrb.mxu3 %vm166_vm1, %v504_v20 }
 0x14d   :  { %v500_v21 = vpop.permute.xlu0 %499 }
 0x14e   :  { %1660 = vmatmul.msk.f32.vlgmr.msrb.gmra.mxu3 %vm166_vm1, %v500_v21 }
 0x155   :  { %v1744_v22 = vpop.permute.xlu0 %1743 }
 0x156   :  { %v1745_v23 = vunpack.i.l.bf16 %v1744_v22  ;;  %v1746_v24 = vunpack.i.h.bf16 %v1744_v22 }
 0x158   :  { %292 = vmatpush.msrb.mxu0 %v1745_v23  ;;  %1716 = vmatpush.msra.mxu2 %v1745_v23 }
 0x15a   :  { %293 = vmatpush.msrb.mxu0 %v1746_v24  ;;  %1717 = vmatpush.msra.mxu2 %v1746_v24 }
 0x15d   :  { %v502_v25 = vpop.permute.xlu0 %501 }
 0x15e   :  { %1661 = vmatmul.msk.f32.gmra.mxu3 %vm166_vm1, %v502_v25 }
 0x165   :  { %v406_v48 = vpop.permute.xlu0 %405 }
 0x16d   :  { %v404_v51 = vpop.permute.xlu0 %403 }
 0x1ae   :  { %v237_v30 = vpop.f32.mrf.mxu1 }
 0x1af   :  { %v238_v31 = vadd.f32 %v237_v30, %v2308_v29 }
 0x1b1   :  { %v244_v32 = vsel %vm243_vm2, %v238_v31, -inf }
 0x1b2   :  { %245 = vmax.xlane.f32.xlu1 %v244_v32 }
 0x1b6   :  { %v240_v37 = vpop.f32.mrf.mxu1 }
 0x1b7   :  { %v241_v40 = vadd.f32 %v240_v37, %v2319_v39 }
 0x1b9   :  { %v336_v33 = vpop.f32.mrf.mxu3  ;;  %v247_v41 = vsel %vm243_vm2, %v241_v40, -inf }
 0x1ba   :  { %v337_v34 = vadd.f32 %v336_v33, %v2308_v29 }
 0x1bc   :  { %v342_v35 = vsel %vm243_vm2, %v337_v34, -inf }
 0x1bd   :  { %343 = vmax.xlane.f32.xlu0 %v342_v35 }
 0x1c1   :  { %v339_v38 = vpop.f32.mrf.mxu3 }
 0x1c2   :  { %v340_v6 = vadd.f32 %v339_v38, %v2319_v39 }
 0x1cb   :  { %407 = vrot.lane.b32.xlu1 %v2255_v9, %s2137_s23  ;;  %v345_v9 = vsel %vm243_vm2, %v340_v6, -inf }
 0x1d1   :  { %v532_v42 = vpop.f32.mrf.mxu3 }
 0x1d2   :  { %v533_v43 = vadd.f32 %v532_v42, %v2308_v29 }
 0x1d4   :  { %v538_v44 = vsel %vm243_vm2, %v533_v43, -inf }
 0x1e1   :  { %v535_v45 = vpop.f32.mrf.mxu3 }
 0x1e2   :  { %v536_v46 = vadd.f32 %v535_v45, %v2319_v39 }
 0x1e4   :  { %v541_v47 = vsel %vm243_vm2, %v536_v46, -inf }
 0x1f5   :  { %248 = vmax.xlane.f32.xlu1 %v247_v41 }
 0x1fd   :  { %539 = vmax.xlane.f32.xlu1 %v538_v44 }
 0x205   :  { %542 = vmax.xlane.f32.xlu1 %v541_v47 }
 0x225   :  { %v246_v49 = vpop.xlane.xlu1 %245 }
 0x226   :  { %v250_v50 = vsub.f32 %v238_v31, %v246_v49 }
 0x228   :  { %v252_v52 = vmul.f32 1.442695, %v250_v50 }
 0x22a   :  { %1815 = vpow2.f32 %v252_v52 }
 0x230   :  { %v1816_v53 = vpop.eup %1815  ;;  %v344_v54 = vpop.xlane.xlu0 %343 }
 0x231   :  { %v348_v55 = vsub.f32 %v337_v34, %v344_v54  ;;  %v256_v56 = vsel %vm243_vm2, %v1816_v53, 0.0 }
 0x232   :  { %257 = vadd.xlane.f32.xlu2 %v256_v56 }
 0x233   :  { %v350_v57 = vmul.f32 1.442695, %v348_v55 }
 0x235   :  { %1817 = vpow2.f32 %v350_v57 }
 0x23b   :  { %v2328_v58 = vpop.eup %1817 }
 0x23c   :  { %v354_v59 = vsel %vm243_vm2, %v2328_v58, 0.0 }
 0x23d   :  { %v408_v60 = vpop.permute.xlu1 %407  ;;  %355 = vadd.xlane.f32.xlu1 %v354_v59 }
 0x23e   :  { %1652 = vmatpush.xpose.msk.msra.mxu0 %vm166_vm1, %v408_v60 }
 0x242   :  { %1653 = vmatpush.xpose.msk.msra.mxu0 %vm166_vm1, %v406_v48 }
 0x24a   :  { %401 = vrot.lane.b32.xlu2 %v2261_v10, %s2138_s5 }
 0x268   :  { %v249_v61 = vpop.xlane.xlu1 %248 }
 0x269   :  { %v251_v62 = vsub.f32 %v241_v40, %v249_v61 }
 0x26b   :  { %v254_v63 = vmul.f32 1.442695, %v251_v62 }
 0x26d   :  { %1819 = vpow2.f32 %v254_v63 }
 0x270   :  { %v540_v7 = vpop.xlane.xlu1 %539 }
 0x271   :  { %v544_v8 = vsub.f32 %v533_v43, %v540_v7 }
 0x273   :  { %v546_v12 = vmul.f32 1.442695, %v544_v8  ;;  %346 = vmax.xlane.f32.xlu2 %v345_v9  ;;  %v1820_v13 = vpop.eup %1819 }
 0x274   :  { %v259_v14 = vsel %vm243_vm2, %v1820_v13, 0.0 }
 0x275   :  { %1821 = vpow2.f32 %v546_v12 }
 0x278   :  { %v543_v20 = vpop.xlane.xlu1 %542 }
 0x279   :  { %v545_v23 = vsub.f32 %v536_v46, %v543_v20 }
 0x27b   :  { %v2339_v15 = vpop.eup %1821  ;;  %260 = vadd.xlane.f32.xlu2 %v259_v14  ;;  %v548_v25 = vmul.f32 1.442695, %v545_v23 }
 0x27c   :  { %v550_v10 = vsel %vm243_vm2, %v2339_v15, 0.0 }
 0x27d   :  { %551 = vadd.xlane.f32.xlu1 %v550_v10 }
 0x296   :  { %1753 = vrot.lane.b32.xlu1 %v2279_v11, %s2139_s24 }
 0x2a5   :  { %v258_v16 = vpop.xlane.xlu2 %257 }
 0x2a6   :  { %1823 = vrcp.f32 %v258_v16 }
 0x2ac   :  { %v1824_v17 = vpop.eup %1823 }
 0x2ad   :  { %v264_v18 = vmul.f32 %v1824_v17, %v1816_v53  ;;  %v402_v19 = vpop.permute.xlu2 %401  ;;  %v2374_v17 = vld [vmem:[#allocation12 + $0x10] sm:$0xff] }
 0x2af   :  { %1644 = vmatmul.msk.f32.vlgmr.msrb.gmra.mxu0 %vm243_vm2, %v264_v18  ;;  %v2376_v18 = vld [vmem:[#allocation12 + $0x18] sm:$0xff] }
 0x2b7   :  { %1654 = vmatmul.msk.f32.vlgmr.msra.gmra.mxu0 %vm166_vm1, %v402_v19  ;;  %v1762_v19 = vpack.i.bf16 %v2376_v18, %v2374_v17 }
 0x2bf   :  { %1655 = vmatmul.msk.f32.gmra.mxu0 %vm166_vm1, %v404_v51  ;;  %v356_v51 = vpop.xlane.xlu1 %355 }
 0x2e6   :  { %v347_v21 = vpop.xlane.xlu2 %346 }
 0x2e7   :  { %v349_v22 = vsub.f32 %v340_v6, %v347_v21  ;;  %v2381_v21 = vld [vmem:[#allocation12] sm:$0xff] }
 0x2e9   :  { %v352_v24 = vmul.f32 1.442695, %v349_v22 }
 0x2eb   :  { %1825 = vpow2.f32 %v352_v24 }
 0x2ee   :  { %v261_v26 = vpop.xlane.xlu2 %260 }
 0x2ef   :  { %1827 = vrcp.f32 %v261_v26 }
 0x2f0   :  { %1829 = vpow2.f32 %v548_v25 }
 0x2f1   :  { %v2347_v28 = vpop.eup %1825 }
 0x2f2   :  { %v357_v30 = vsel %vm243_vm2, %v2347_v28, 0.0 }
 0x2f3   :  { %358 = vadd.xlane.f32.xlu2 %v357_v30 }
 0x2f5   :  { %v1828_v31 = vpop.eup %1827 }
 0x2f6   :  { %v265_v32 = vmul.f32 %v1828_v31, %v1820_v13  ;;  %v2351_v33 = vpop.eup %1829 }
 0x2f7   :  { %v553_v34 = vsel %vm243_vm2, %v2351_v33, 0.0 }
 0x2f8   :  { %1645 = vmatmul.msk.f32.vlgmr.msra.gmra.mxu2 %vm243_vm2, %v265_v32 }
 0x2fb   :  { %554 = vadd.xlane.f32.xlu2 %v553_v34 }
 0x32c   :  { %v295_v35 = vpop.f32.mrf.mxu0 }
 0x32d   :  { %301 = vst.msk [vmem:[#allocation2] sm:$0xff] %vm166_vm1, %v295_v35 }
 0x334   :  { %v434_v37 = vpop.f32.mrf.mxu0 }
 0x335   :  { %v435_v38 = vadd.f32 %v434_v37, %v2308_v29 }
 0x337   :  { %v440_v40 = vsel %vm243_vm2, %v435_v38, -inf }
 0x338   :  { %441 = vmax.xlane.f32.xlu0 %v440_v40 }
 0x33c   :  { %v437_v41 = vpop.f32.mrf.mxu0 }
 0x33d   :  { %v438_v42 = vadd.f32 %v437_v41, %v2319_v39 }
 0x33f   :  { %v443_v43 = vsel %vm243_vm2, %v438_v42, -inf }
 0x340   :  { %444 = vmax.xlane.f32.xlu0 %v443_v43 }
 0x354   :  { %1748 = vrot.lane.b32.xlu0 %v2279_v11, %s2140_s25 }
 0x35c   :  { %1758 = vrot.lane.b32.xlu0 %v2279_v11, %s2141_s26  ;;  %v552_v11 = vpop.xlane.xlu1 %551 }
 0x364   :  { %v1754_v59 = vpop.permute.xlu1 %1753  ;;  %1763 = vrot.lane.b32.xlu0 %v1762_v19, %s2136_s22 }
 0x365   :  { %v1755_v62 = vunpack.i.l.bf16 %v1754_v59  ;;  %v1756_v63 = vunpack.i.h.bf16 %v1754_v59 }
 0x366   :  { %v359_v54 = vpop.xlane.xlu2 %358 }
 0x36e   :  { %v555_v13 = vpop.xlane.xlu2 %554 }
 0x37b   :  { %v298_v44 = vpop.f32.mrf.mxu2 }
 0x37c   :  { %302 = vst.msk [vmem:[#allocation2 + $0x20] sm:$0xff] %vm166_vm1, %v298_v44 }
 0x3ab   :  { %v442_v45 = vpop.xlane.xlu0 %441 }
 0x3ac   :  { %v446_v29 = vsub.f32 %v435_v38, %v442_v45 }
 0x3ae   :  { %v448_v46 = vmul.f32 1.442695, %v446_v29 }
 0x3b0   :  { %1831 = vpow2.f32 %v448_v46 }
 0x3b3   :  { %v445_v47 = vpop.xlane.xlu0 %444 }
 0x3b4   :  { %v447_v48 = vsub.f32 %v438_v42, %v445_v47 }
 0x3b6   :  { %v1832_v49 = vpop.eup %1831  ;;  %v450_v39 = vmul.f32 1.442695, %v447_v48 }
 0x3b7   :  { %v452_v50 = vsel %vm243_vm2, %v1832_v49, 0.0 }
 0x3b8   :  { %1833 = vpow2.f32 %v450_v39  ;;  %453 = vadd.xlane.f32.xlu2 %v452_v50 }
 0x3b9   :  { %1835 = vrcp.f32 %v356_v51 }
 0x3ba   :  { %1837 = vrcp.f32 %v359_v54 }
 0x3bb   :  { %1839 = vrcp.f32 %v552_v11 }
 0x3bc   :  { %1841 = vrcp.f32 %v555_v13 }
 0x3be   :  { %v1834_v52 = vpop.eup %1833 }
 0x3bf   :  { %v455_v53 = vsel %vm243_vm2, %v1834_v52, 0.0  ;;  %v1836_v56 = vpop.eup %1835 }
 0x3c0   :  { %456 = vadd.xlane.f32.xlu2 %v455_v53  ;;  %v362_v61 = vmul.f32 %v1836_v56, %v2328_v58  ;;  %v1838_v7 = vpop.eup %1837 }
 0x3c1   :  { %v363_v12 = vmul.f32 %v1838_v7, %v2347_v28  ;;  %v1840_v58 = vpop.eup %1839 }
 0x3c2   :  { %v558_v14 = vmul.f32 %v1840_v58, %v2339_v15  ;;  %v1842_v10 = vpop.eup %1841  ;;  %v2383_v15 = vld [vmem:[#allocation12 + $0x8] sm:$0xff] }
 0x3c3   :  { %v559_v16 = vmul.f32 %v1842_v10, %v2351_v33  ;;  %v1767_v22 = vpack.i.bf16 %v2381_v21, %v2383_v15 }
 0x3c6   :  { %v1749_v55 = vpop.permute.xlu0 %1748 }
 0x3c7   :  { %v1750_v57 = vunpack.i.l.bf16 %v1749_v55  ;;  %v1751_v60 = vunpack.i.h.bf16 %v1749_v55  ;;  %v1803_v55 = vld [vmem:[#allocation15 + $0x3] ss:$0 sm:$0xff] }
 0x3c9   :  { %390 = vmatpush.msrb.mxu2 %v1750_v57 }
 0x3cb   :  { %391 = vmatpush.msrb.mxu2 %v1751_v60 }
 0x3cc   :  { %1650 = vmatmul.msk.f32.vlgmr.msrb.gmra.mxu2 %vm243_vm2, %v362_v61 }
 0x3cd   :  { %586 = vmatpush.msra.mxu2 %v1755_v62 }
 0x3ce   :  { %v1759_v6 = vpop.permute.xlu0 %1758 }
 0x3cf   :  { %587 = vmatpush.msra.mxu2 %v1756_v63  ;;  %v1760_v8 = vunpack.i.l.bf16 %v1759_v6  ;;  %v1761_v9 = vunpack.i.h.bf16 %v1759_v6 }
 0x3d1   :  { %488 = vmatpush.msrb.mxu1 %v1760_v8 }
 0x3d3   :  { %489 = vmatpush.msrb.mxu1 %v1761_v9 }
 0x3d4   :  { %1651 = vmatmul.msk.f32.gmra.mxu2 %vm243_vm2, %v363_v12 }
 0x3d6   :  { %v1764_v34 = vpop.permute.xlu0 %1763 }
 0x3d7   :  { %v1766_v35 = vunpack.i.h.bf16 %v1764_v34  ;;  %v1765_v37 = vunpack.i.l.bf16 %v1764_v34  ;;  %v153_v34 = vld [vmem:[#allocation3] sm:$0xff] }
 0x3d8   :  { %1768 = vrot.lane.b32.xlu2 %v1767_v22, %s2136_s22 }
 0x3d9   :  { %703 = vmatpush.msra.mxu3 %v1765_v37  ;;  %742 = vmatpush.msrb.mxu2 %v1766_v35  ;;  %v155_v35 = vld [vmem:[#allocation3 + $0x8] sm:$0xff] }
 0x3dc   :  { %1662 = vmatmul.msk.f32.vlgmr.msra.gmra.mxu2 %vm243_vm2, %v558_v14  ;;  %v2142_v14 = vmov 32.0  }
 0x3e4   :  { %1663 = vmatmul.msk.f32.gmra.mxu2 %vm243_vm2, %v559_v16 }
 0x42b   :  { %v454_v20 = vpop.xlane.xlu2 %453 }
 0x42c   :  { %1843 = vrcp.f32 %v454_v20 }
 0x432   :  { %v1844_v23 = vpop.eup %1843 }
 0x433   :  { %v457_v24 = vpop.xlane.xlu2 %456  ;;  %v460_v25 = vmul.f32 %v1844_v23, %v1832_v49 }
 0x434   :  { %1845 = vrcp.f32 %v457_v24 }
 0x435   :  { %1656 = vmatmul.msk.f32.vlgmr.msrb.gmra.mxu1 %vm243_vm2, %v460_v25  ;;  %1847 = vrcp.f32 %v2142_v14 }
 0x43a   :  { %v1846_v26 = vpop.eup %1845 }
 0x43b   :  { %v461_v28 = vmul.f32 %v1846_v26, %v1834_v52  ;;  %v1769_v38 = vpop.permute.xlu2 %1768  ;;  %v1848_v10 = vpop.eup %1847 }
 0x43c   :  { %v1771_v40 = vunpack.i.h.bf16 %v1769_v38  ;;  %v1770_v41 = vunpack.i.l.bf16 %v1769_v38  ;;  %v767_v16 = vmul.f32 32.0, %v1848_v10  ;;  %vm771_vm3 = vweird.f32 %v1848_v10 }
 0x43d   :  { %1657 = vmatmul.msk.f32.gmra.mxu1 %vm243_vm2, %v461_v28 }
 0x43e   :  { %633 = vmatpush.msrb.mxu0 %v1770_v41  ;;  %666 = vmatpush.msra.mxu1 %v1771_v40  ;;  %v768_v19 = vsub.f32 1.0, %v767_v16 }
 0x440   :  { %837 = vmatpush.msra.mxu0 %v2376_v18  ;;  %v769_v20 = vmul.f32 %v1848_v10, %v768_v19 }
 0x442   :  { %838 = vmatpush.msra.mxu0 %v2374_v17  ;;  %v770_v22 = vadd.f32 %v1848_v10, %v769_v20 }
 0x444   :  { %839 = vmatpush.msra.mxu0 %v2383_v15  ;;  %v2415_v23 = vsel %vm771_vm3, %v1848_v10, %v770_v22 }
 0x446   :  { %840 = vmatpush.msra.mxu0 %v2381_v21 }
 0x44f   :  { %v393_v30 = vpop.f32.mrf.mxu2 }
 0x450   :  { %399 = vst.msk [vmem:[#allocation2 + $0x8] sm:$0xff] %vm166_vm1, %v393_v30 }
 0x457   :  { %v396_v31 = vpop.f32.mrf.mxu2 }
 0x458   :  { %400 = vst.msk [vmem:[#allocation2 + $0x28] sm:$0xff] %vm166_vm1, %v396_v31 }
 0x45f   :  { %v589_v32 = vpop.f32.mrf.mxu2 }
 0x460   :  { %595 = vst.msk [vmem:[#allocation2 + $0x18] sm:$0xff] %vm166_vm1, %v589_v32 }
 0x467   :  { %v592_v33 = vpop.f32.mrf.mxu2 }
 0x468   :  { %596 = vst.msk [vmem:[#allocation2 + $0x38] sm:$0xff] %vm166_vm1, %v592_v33  ;;  %v1777_v33 = vpack.i.bf16 %v2242_v3, %v2240_v2 }
 0x4b2   :  { %v491_v42 = vpop.f32.mrf.mxu1 }
 0x4b3   :  { %497 = vst.msk [vmem:[#allocation2 + $0x10] sm:$0xff] %vm166_vm1, %v491_v42 }
 0x4ba   :  { %v494_v43 = vpop.f32.mrf.mxu1  ;;  %v605_v44 = vld [vmem:[#allocation2 + $0x1] ss:$4 sm:$0xff]  ;;  %v601_v45 = vld [vmem:[#allocation2] ss:$4 sm:$0xff]  ;;  %v675_v29 = vld [vmem:[#allocation2 + $0x2] ss:$4 sm:$0xff] }
 0x4bb   :  { %498 = vst.msk [vmem:[#allocation2 + $0x30] sm:$0xff] %vm166_vm1, %v494_v43  ;;  %1664 = vmatmul.msk.f32.vlgmr.msrb.gmra.mxu0 %vm166_vm1, %v605_v44  ;;  %1666 = vmatmul.msk.f32.vlgmr.msra.gmra.mxu1 %vm166_vm1, %v601_v45  ;;  %v714_v46 = vld [vmem:[#allocation2 + $0x3] ss:$4 sm:$0xff] }
 0x4bc   :  { %1668 = vmatmul.msk.f32.vlgmr.msra.gmra.mxu3 %vm166_vm1, %v675_v29  ;;  %1670 = vmatmul.msk.f32.vlgmr.msrb.gmra.mxu2 %vm166_vm1, %v714_v46 }
 0x4c2   :  { %v607_v47 = vld [vmem:[#allocation2 + $0x21] ss:$4 sm:$0xff]  ;;  %v603_v48 = vld [vmem:[#allocation2 + $0x20] ss:$4 sm:$0xff]  ;;  %v677_v49 = vld [vmem:[#allocation2 + $0x22] ss:$4 sm:$0xff] }
 0x4c3   :  { %1665 = vmatmul.msk.f32.gmra.mxu0 %vm166_vm1, %v607_v47  ;;  %1667 = vmatmul.msk.f32.gmra.mxu1 %vm166_vm1, %v603_v48  ;;  %v716_v39 = vld [vmem:[#allocation2 + $0x23] ss:$4 sm:$0xff] }
 0x4c4   :  { %1669 = vmatmul.msk.f32.gmra.mxu3 %vm166_vm1, %v677_v49  ;;  %1671 = vmatmul.msk.f32.gmra.mxu2 %vm166_vm1, %v716_v39 }
 0x4cb   :  { %1672 = vmatmul.msk.f32.vlgmr.msra.gmra.mxu0 %vm176_vm0, %v153_v34 }
 0x4d3   :  { %1673 = vmatmul.msk.f32.gmra.mxu0 %vm176_vm0, %v155_v35 }
 0x538   :  { %v635_v50 = vpop.f32.mrf.mxu0  ;;  %v668_v51 = vpop.f32.mrf.mxu1 }
 0x539   :  { %v669_v52 = vadd.f32 %v668_v51, %v635_v50 }
 0x53f   :  { %v705_v53 = vpop.f32.mrf.mxu3  ;;  %v744_v11 = vpop.f32.mrf.mxu2 }
 0x540   :  { %v711_v54 = vadd.f32 %v705_v53, %v669_v52  ;;  %v638_v57 = vpop.f32.mrf.mxu0  ;;  %v671_v59 = vpop.f32.mrf.mxu1  ;;  %v1804_v53 = vld [vmem:[#allocation15 + $0x7] ss:$0 sm:$0xff] }
 0x541   :  { %v672_v61 = vadd.f32 %v671_v59, %v638_v57  ;;  %v1805_v59 = vld [vmem:[#allocation15 + $0x8] ss:$0 sm:$0xff] }
 0x542   :  { %v750_v56 = vadd.f32 %v744_v11, %v711_v54 }
 0x544   :  { %v754_v60 = vadd.f32 %v1803_v55, %v750_v56 }
 0x546   :  { %v756_v62 = vadd.f32 %v754_v60, %v2245_v4  ;;  %v1772_v4 = vpack.i.bf16 %v2237_v1, %v2235_v0 }
 0x547   :  { %v708_v63 = vpop.f32.mrf.mxu3  ;;  %v747_v8 = vpop.f32.mrf.mxu2 }
 0x548   :  { %v712_v6 = vadd.f32 %v708_v63, %v672_v61  ;;  %v760_v7 = vsel %vm176_vm0, %v756_v62, 0.0 }
 0x549   :  { %761 = vadd.xlane.f32.xlu0 %v760_v7 }
 0x54a   :  { %v751_v9 = vadd.f32 %v747_v8, %v712_v6 }
 0x54c   :  { %v755_v12 = vadd.f32 %v1803_v55, %v751_v9 }
 0x54e   :  { %v757_v13 = vadd.f32 %v755_v12, %v2251_v5  ;;  %v842_v12 = vpop.f32.mrf.mxu0 }
 0x550   :  { %v763_v58 = vsel %vm176_vm0, %v757_v13, 0.0 }
 0x551   :  { %764 = vadd.xlane.f32.xlu1 %v763_v58 }
 0x556   :  { %v845_v14 = vpop.f32.mrf.mxu0 }
 0x56a   :  { %1773 = vrot.lane.b32.xlu1 %v1772_v4, %s2143_s0  ;;  %v1807_v4 = vld [vmem:[#allocation15 + $0x2] ss:$0 sm:$0xff] }
 0x5bc   :  { %v762_v5 = vpop.xlane.xlu0 %761 }
 0x5bd   :  { %v773_v24 = vmul.f32 %v2415_v23, %v762_v5 }
 0x5bf   :  { %v775_v25 = vsub.f32 %v756_v62, %v773_v24 }
 0x5c1   :  { %v777_v26 = vmul.f32 %v775_v25, %v775_v25 }
 0x5c3   :  { %v779_v28 = vsel %vm176_vm0, %v777_v26, 0.0 }
 0x5c4   :  { %v765_v30 = vpop.xlane.xlu1 %764  ;;  %780 = vadd.xlane.f32.xlu2 %v779_v28 }
 0x5c5   :  { %v774_v0 = vmul.f32 %v2415_v23, %v765_v30 }
 0x5c7   :  { %v776_v1 = vsub.f32 %v757_v13, %v774_v0  ;;  %v1806_v13 = vld [vmem:[#allocation15 + $0x1] ss:$0 sm:$0xff] }
 0x5c8   :  { %v843_v58 = vadd.f32 %v1806_v13, %v842_v12  ;;  %v846_v10 = vadd.f32 %v1806_v13, %v845_v14 }
 0x5c9   :  { %v778_v31 = vmul.f32 %v776_v1, %v776_v1 }
 0x5ca   :  { %1676 = vmatpush.xpose.msk.msrb.mxu3 %vm166_vm1, %v846_v10  ;;  %v2437_v16 = vpack.i.bf16 %v843_v58, %v846_v10 }
 0x5cb   :  { %v782_v32 = vsel %vm176_vm0, %v778_v31, 0.0 }
 0x5cc   :  { %783 = vadd.xlane.f32.xlu0 %v782_v32 }
 0x5ce   :  { %1677 = vmatpush.xpose.msk.msrb.mxu3 %vm166_vm1, %v843_v58 }
 0x5dc   :  { %v1774_v37 = vpop.permute.xlu1 %1773 }
 0x5dd   :  { %v1775_v38 = vunpack.i.l.bf16 %v1774_v37  ;;  %v1776_v40 = vunpack.i.h.bf16 %v1774_v37 }
 0x5df   :  { %888 = vmatpush.msrb.mxu1 %v1775_v38 }
 0x5e0   :  { %1778 = vrot.lane.b32.xlu0 %v1777_v33, %s2143_s0 }
 0x5e1   :  { %889 = vmatpush.msrb.mxu1 %v1776_v40 }
 0x5e8   :  { %1783 = vrot.lane.b32.xlu0 %v2437_v16, %s2132_s3 }
 0x5f0   :  { %997 = vrot.lane.b32.xlu0 %v846_v10, %s2133_s19 }
 0x637   :  { %v781_v41 = vpop.xlane.xlu2 %780 }
 0x638   :  { %v785_v42 = vmul.f32 %v781_v41, %v2415_v23 }
 0x63a   :  { %v787_v43 = vadd.f32 1e-05, %v785_v42 }
 0x63c   :  { %1849 = vrsqrt.f32 %v787_v43  ;;  %vm795_vm5 = vweird.f32 %v787_v43 }
 0x63f   :  { %v784_v44 = vpop.xlane.xlu0 %783 }
 0x640   :  { %v786_v2 = vmul.f32 %v784_v44, %v2415_v23 }
 0x642   :  { %v1850_v3 = vpop.eup %1849  ;;  %v788_v45 = vadd.f32 1e-05, %v786_v2 }
 0x643   :  { %v790_v29 = vmul.f32 %v1850_v3, %v787_v43  ;;  %vm796_vm4 = vweird.f32 %v1850_v3 }
 0x644   :  { %1851 = vrsqrt.f32 %v788_v45  ;;  %vm797_vm6 = vmor %vm795_vm5, %vm796_vm4  ;;  %vm805_vm8 = vweird.f32 %v788_v45 }
 0x645   :  { %v791_v46 = vmul.f32 %v1850_v3, %v790_v29 }
 0x647   :  { %v792_v47 = vmul.f32 0.5, %v791_v46 }
 0x649   :  { %v793_v48 = vsub.f32 1.5, %v792_v47 }
 0x64a   :  { %v1852_v49 = vpop.eup %1851 }
 0x64b   :  { %v794_v39 = vmul.f32 %v1850_v3, %v793_v48  ;;  %v800_v50 = vmul.f32 %v1852_v49, %v788_v45  ;;  %vm806_vm7 = vweird.f32 %v1852_v49 }
 0x64c   :  { %vm807_vm9 = vmor %vm805_vm8, %vm806_vm7 }
 0x64d   :  { %v798_v51 = vsel %vm797_vm6, %v1850_v3, %v794_v39  ;;  %v801_v52 = vmul.f32 %v1852_v49, %v800_v50 }
 0x64e   :  { %v809_v11 = vmul.f32 %v798_v51, %v775_v25 }
 0x64f   :  { %v802_v54 = vmul.f32 0.5, %v801_v52 }
 0x650   :  { %v812_v56 = vmul.f32 %v1804_v53, %v809_v11 }
 0x651   :  { %v803_v55 = vsub.f32 1.5, %v802_v54 }
 0x652   :  { %v1779_v57 = vpop.permute.xlu0 %1778  ;;  %v2428_v6 = vadd.f32 %v1805_v59, %v812_v56 }
 0x653   :  { %v804_v60 = vmul.f32 %v1852_v49, %v803_v55  ;;  %v1780_v61 = vunpack.i.l.bf16 %v1779_v57  ;;  %v1781_v63 = vunpack.i.h.bf16 %v1779_v57 }
 0x655   :  { %v808_v62 = vsel %vm807_vm9, %v1852_v49, %v804_v60  ;;  %890 = vmatpush.msrb.mxu1 %v1780_v61 }
 0x656   :  { %v810_v7 = vmul.f32 %v808_v62, %v776_v1 }
 0x657   :  { %891 = vmatpush.msrb.mxu1 %v1781_v63 }
 0x658   :  { %1674 = vmatmul.msk.f32.vlgmr.msrb.gmra.mxu1 %vm176_vm0, %v2428_v6  ;;  %v813_v8 = vmul.f32 %v1804_v53, %v810_v7 }
 0x65a   :  { %v2432_v9 = vadd.f32 %v1805_v59, %v813_v8  ;;  %v1784_v24 = vpop.permute.xlu0 %1783 }
 0x65b   :  { %v1786_v25 = vunpack.i.h.bf16 %v1784_v24  ;;  %v1785_v26 = vunpack.i.l.bf16 %v1784_v24 }
 0x65d   :  { %982 = vmatpush.msra.mxu2 %v1785_v26 }
 0x65f   :  { %983 = vmatpush.msra.mxu2 %v1786_v25 }
 0x660   :  { %1675 = vmatmul.msk.f32.gmra.mxu1 %vm176_vm0, %v2432_v9 }
 0x662   :  { %v998_v28 = vpop.permute.xlu0 %997 }
 0x663   :  { %1682 = vmatpush.xpose.msk.msrb.mxu0 %vm166_vm1, %v998_v28 }
 0x6d5   :  { %v893_v19 = vpop.f32.mrf.mxu1 }
 0x6d6   :  { %v894_v20 = vadd.f32 %v1807_v4, %v893_v19 }
 0x6d8   :  { %991 = vrot.lane.b32.xlu0 %v894_v20, %s2133_s19  ;;  %1678 = vmatmul.msk.f32.vlgmr.msrb.gmra.mxu3 %vm166_vm1, %v894_v20 }
 0x6dd   :  { %v896_v22 = vpop.f32.mrf.mxu1 }
 0x6de   :  { %v897_v5 = vadd.f32 %v1807_v4, %v896_v22 }
 0x6e0   :  { %1119 = vrot.lane.b32.xlu0 %v2381_v21, %s2143_s0  ;;  %1679 = vmatmul.msk.f32.gmra.mxu3 %vm166_vm1, %v897_v5 }
 0x6e8   :  { %993 = vrot.lane.b32.xlu0 %v897_v5, %s2133_s19 }
 0x6f0   :  { %1155 = vrot.lane.b32.xlu0 %v843_v58, %s2138_s5 }
 0x6f8   :  { %1151 = vrot.lane.b32.xlu0 %v894_v20, %s2138_s5 }
 0x700   :  { %1153 = vrot.lane.b32.xlu0 %v897_v5, %s2138_s5 }
 0x74a   :  { %v992_v30 = vpop.permute.xlu0 %991 }
 0x752   :  { %v1120_v21 = vpop.permute.xlu0 %1119 }
 0x753   :  { %1143 = vmatpush.msrb.mxu2 %v1120_v21 }
 0x75a   :  { %v994_v48 = vpop.permute.xlu0 %993 }
 0x75b   :  { %v928_v0 = vpop.f32.mrf.mxu3 }
 0x75c   :  { %v929_v1 = vadd.f32 %v928_v0, %v2304_v27 }
 0x75e   :  { %v934_v31 = vsel %vm243_vm2, %v929_v1, -inf }
 0x75f   :  { %935 = vmax.xlane.f32.xlu2 %v934_v31 }
 0x762   :  { %v1156_v52 = vpop.permute.xlu0 %1155 }
 0x763   :  { %v931_v32 = vpop.f32.mrf.mxu3 }
 0x764   :  { %v932_v33 = vadd.f32 %v931_v32, %v2316_v36 }
 0x766   :  { %v937_v34 = vsel %vm243_vm2, %v932_v33, -inf }
 0x767   :  { %938 = vmax.xlane.f32.xlu1 %v937_v34 }
 0x76a   :  { %v1152_v54 = vpop.permute.xlu0 %1151 }
 0x772   :  { %v1154_v55 = vpop.permute.xlu0 %1153 }
 0x780   :  { %1157 = vrot.lane.b32.xlu1 %v846_v10, %s2138_s5 }
 0x7d2   :  { %v936_v35 = vpop.xlane.xlu2 %935 }
 0x7d3   :  { %v940_v37 = vsub.f32 %v929_v1, %v936_v35 }
 0x7d5   :  { %v942_v38 = vmul.f32 1.442695, %v940_v37 }
 0x7d7   :  { %1853 = vpow2.f32 %v942_v38 }
 0x7da   :  { %v939_v40 = vpop.xlane.xlu1 %938 }
 0x7db   :  { %v941_v41 = vsub.f32 %v932_v33, %v939_v40 }
 0x7dd   :  { %v1854_v42 = vpop.eup %1853  ;;  %v944_v43 = vmul.f32 1.442695, %v941_v41 }
 0x7de   :  { %v946_v44 = vsel %vm243_vm2, %v1854_v42, 0.0 }
 0x7df   :  { %1855 = vpow2.f32 %v944_v43  ;;  %947 = vadd.xlane.f32.xlu2 %v946_v44 }
 0x7e5   :  { %v1856_v2 = vpop.eup %1855 }
 0x7e6   :  { %v949_v3 = vsel %vm243_vm2, %v1856_v2, 0.0 }
 0x7e7   :  { %950 = vadd.xlane.f32.xlu2 %v949_v3 }
 0x7f2   :  { %v1158_v51 = vpop.permute.xlu1 %1157 }
 0x7ff   :  { %995 = vrot.lane.b32.xlu2 %v843_v58, %s2133_s19 }
 0x807   :  { %1287 = vrot.lane.b32.xlu2 %v846_v10, %s2135_s21 }
 0x80f   :  { %1285 = vrot.lane.b32.xlu2 %v843_v58, %s2135_s21 }
 0x817   :  { %1281 = vrot.lane.b32.xlu2 %v894_v20, %s2135_s21 }
 0x81f   :  { %1283 = vrot.lane.b32.xlu2 %v897_v5, %s2135_s21 }
 0x852   :  { %v948_v45 = vpop.xlane.xlu2 %947 }
 0x853   :  { %1857 = vrcp.f32 %v948_v45 }
 0x859   :  { %v1858_v29 = vpop.eup %1857 }
 0x85a   :  { %v954_v46 = vmul.f32 %v1858_v29, %v1854_v42  ;;  %v951_v47 = vpop.xlane.xlu2 %950 }
 0x85b   :  { %1859 = vrcp.f32 %v951_v47 }
 0x85c   :  { %1680 = vmatmul.msk.f32.vlgmr.msra.gmra.mxu2 %vm243_vm2, %v954_v46 }
 0x861   :  { %v1860_v49 = vpop.eup %1859 }
 0x862   :  { %v996_v39 = vpop.permute.xlu2 %995  ;;  %v955_v50 = vmul.f32 %v1860_v49, %v1856_v2 }
 0x863   :  { %1683 = vmatpush.xpose.msk.msrb.mxu0 %vm166_vm1, %v996_v39 }
 0x864   :  { %1681 = vmatmul.msk.f32.gmra.mxu2 %vm243_vm2, %v955_v50 }
 0x866   :  { %1684 = vmatmul.msk.f32.vlgmr.msrb.gmra.mxu0 %vm166_vm1, %v992_v30 }
 0x867   :  { %1692 = vmatpush.xpose.msk.msra.mxu0 %vm166_vm1, %v1158_v51 }
 0x86a   :  { %v1288_v53 = vpop.permute.xlu2 %1287 }
 0x86b   :  { %1693 = vmatpush.xpose.msk.msra.mxu0 %vm166_vm1, %v1156_v52  ;;  %1700 = vmatpush.xpose.msk.msra.mxu2 %vm166_vm1, %v1288_v53 }
 0x86e   :  { %1685 = vmatmul.msk.f32.gmra.mxu0 %vm166_vm1, %v994_v48 }
 0x872   :  { %v1286_v11 = vpop.permute.xlu2 %1285 }
 0x873   :  { %1701 = vmatpush.xpose.msk.msra.mxu2 %vm166_vm1, %v1286_v11 }
 0x876   :  { %1694 = vmatmul.msk.f32.vlgmr.msra.gmra.mxu0 %vm166_vm1, %v1152_v54 }
 0x87a   :  { %v1282_v7 = vpop.permute.xlu2 %1281 }
 0x87e   :  { %1695 = vmatmul.msk.f32.gmra.mxu0 %vm166_vm1, %v1154_v55 }
 0x882   :  { %v1284_v14 = vpop.permute.xlu2 %1283 }
 0x8df   :  { %v985_v56 = vpop.f32.mrf.mxu2 }
 0x8e0   :  { %1690 = vmatmul.msk.f32.vlgmr.msrb.gmra.mxu2 %vm166_vm1, %v985_v56 }
 0x8e3   :  { %v1024_v57 = vpop.f32.mrf.mxu0 }
 0x8e4   :  { %v1025_v59 = vadd.f32 %v1024_v57, %v2304_v27 }
 0x8e6   :  { %v1030_v60 = vsel %vm243_vm2, %v1025_v59, -inf }
 0x8e7   :  { %v988_v61 = vpop.f32.mrf.mxu2  ;;  %1031 = vmax.xlane.f32.xlu0 %v1030_v60 }
 0x8e8   :  { %1691 = vmatmul.msk.f32.gmra.mxu2 %vm166_vm1, %v988_v61 }
 0x8eb   :  { %v1027_v62 = vpop.f32.mrf.mxu0 }
 0x8ec   :  { %v1028_v63 = vadd.f32 %v1027_v62, %v2316_v36 }
 0x8ee   :  { %v1033_v8 = vsel %vm243_vm2, %v1028_v63, -inf }
 0x8ef   :  { %1034 = vmax.xlane.f32.xlu1 %v1033_v8 }
 0x8f0   :  { %1702 = vmatmul.msk.f32.vlgmr.msra.gmra.mxu2 %vm166_vm1, %v1282_v7 }
 0x8f3   :  { %v1184_v12 = vpop.f32.mrf.mxu0 }
 0x8f4   :  { %v1185_v13 = vadd.f32 %v1184_v12, %v2304_v27 }
 0x8f6   :  { %v1190_v58 = vsel %vm243_vm2, %v1185_v13, -inf }
 0x8f7   :  { %1191 = vmax.xlane.f32.xlu2 %v1190_v58 }
 0x8f8   :  { %1703 = vmatmul.msk.f32.gmra.mxu2 %vm166_vm1, %v1284_v14 }
 0x8fb   :  { %v1187_v10 = vpop.f32.mrf.mxu0 }
 0x8fc   :  { %v1188_v4 = vadd.f32 %v1187_v10, %v2316_v36 }
 0x8fe   :  { %v1193_v19 = vsel %vm243_vm2, %v1188_v4, -inf }
 0x8ff   :  { %1194 = vmax.xlane.f32.xlu0 %v1193_v19 }
 0x95a   :  { %v1032_v20 = vpop.xlane.xlu0 %1031 }
 0x95b   :  { %v1036_v22 = vsub.f32 %v1025_v59, %v1032_v20 }
 0x95d   :  { %v1038_v5 = vmul.f32 1.442695, %v1036_v22 }
 0x95f   :  { %1861 = vpow2.f32 %v1038_v5 }
 0x962   :  { %v1035_v1 = vpop.xlane.xlu1 %1034 }
 0x963   :  { %v2488_v24 = vpop.f32.mrf.mxu2  ;;  %v1037_v37 = vsub.f32 %v1028_v63, %v1035_v1 }
 0x965   :  { %v1862_v25 = vpop.eup %1861  ;;  %v1040_v42 = vmul.f32 1.442695, %v1037_v37 }
 0x966   :  { %v1042_v26 = vsel %vm243_vm2, %v1862_v25, 0.0 }
 0x967   :  { %1043 = vadd.xlane.f32.xlu0 %v1042_v26 }
 0x96a   :  { %v1192_v28 = vpop.xlane.xlu2 %1191 }
 0x96b   :  { %v1196_v30 = vsub.f32 %v1185_v13, %v1192_v28  ;;  %v2491_v21 = vpop.f32.mrf.mxu2 }
 0x96d   :  { %v1198_v0 = vmul.f32 1.442695, %v1196_v30 }
 0x96f   :  { %1863 = vpow2.f32 %v1198_v0 }
 0x972   :  { %v1195_v31 = vpop.xlane.xlu0 %1194 }
 0x973   :  { %v1197_v32 = vsub.f32 %v1188_v4, %v1195_v31  ;;  %v1314_v33 = vpop.f32.mrf.mxu2 }
 0x974   :  { %v1315_v34 = vadd.f32 %v1314_v33, %v2304_v27 }
 0x975   :  { %v2494_v35 = vpop.eup %1863  ;;  %v1200_v38 = vmul.f32 1.442695, %v1197_v32 }
 0x976   :  { %v1320_v40 = vsel %vm243_vm2, %v1315_v34, -inf  ;;  %v1202_v41 = vsel %vm243_vm2, %v2494_v35, 0.0 }
 0x977   :  { %1865 = vpow2.f32 %v1200_v38  ;;  %1321 = vmax.xlane.f32.xlu1 %v1320_v40  ;;  %1203 = vadd.xlane.f32.xlu0 %v1202_v41 }
 0x978   :  { %1867 = vpow2.f32 %v1040_v42  ;;  %v1808_v42 = vld [vmem:[#allocation15 + $0x4] ss:$0 sm:$0xff] }
 0x97b   :  { %v1317_v43 = vpop.f32.mrf.mxu2 }
 0x97c   :  { %v1318_v44 = vadd.f32 %v1317_v43, %v2316_v36 }
 0x97d   :  { %v1866_v2 = vpop.eup %1865 }
 0x97e   :  { %v1323_v27 = vsel %vm243_vm2, %v1318_v44, -inf  ;;  %v1205_v3 = vsel %vm243_vm2, %v1866_v2, 0.0  ;;  %v1868_v45 = vpop.eup %1867 }
 0x97f   :  { %1324 = vmax.xlane.f32.xlu2 %v1323_v27  ;;  %1206 = vadd.xlane.f32.xlu0 %v1205_v3  ;;  %v1045_v29 = vsel %vm243_vm2, %v1868_v45, 0.0 }
 0x987   :  { %1046 = vadd.xlane.f32.xlu2 %v1045_v29 }
 0x990   :  { %1788 = vrot.lane.b32.xlu1 %v2437_v16, %s2131_s7 }
 0x998   :  { %1798 = vrot.lane.b32.xlu1 %v2437_v16, %s2134_s20 }
 0x99f   :  { %1793 = vrot.lane.b32.xlu2 %v2437_v16, %s2137_s23 }
 0x9a0   :  { %1087 = vrot.lane.b32.xlu1 %v2383_v15, %s2143_s0 }
 0x9a7   :  { %1247 = vrot.lane.b32.xlu2 %v2374_v17, %s2143_s0 }
 0x9da   :  { %v1044_v52 = vpop.xlane.xlu0 %1043 }
 0x9ea   :  { %v1322_v36 = vpop.xlane.xlu1 %1321  ;;  %v1204_v60 = vpop.xlane.xlu0 %1203 }
 0x9eb   :  { %v1326_v46 = vsub.f32 %v1315_v34, %v1322_v36 }
 0x9ed   :  { %v1328_v47 = vmul.f32 1.442695, %v1326_v46 }
 0x9ef   :  { %1869 = vpow2.f32 %v1328_v47 }
 0x9f2   :  { %v1325_v48 = vpop.xlane.xlu2 %1324  ;;  %v1207_v13 = vpop.xlane.xlu0 %1206 }
 0x9f3   :  { %v1327_v49 = vsub.f32 %v1318_v44, %v1325_v48 }
 0x9f5   :  { %v1870_v39 = vpop.eup %1869  ;;  %v1330_v50 = vmul.f32 1.442695, %v1327_v49 }
 0x9f6   :  { %v1332_v51 = vsel %vm243_vm2, %v1870_v39, 0.0 }
 0x9f7   :  { %1871 = vpow2.f32 %v1330_v50  ;;  %1333 = vadd.xlane.f32.xlu0 %v1332_v51 }
 0x9f8   :  { %1873 = vrcp.f32 %v1044_v52 }
 0x9fa   :  { %v1047_v16 = vpop.xlane.xlu2 %1046 }
 0x9fb   :  { %1875 = vrcp.f32 %v1047_v16 }
 0x9fc   :  { %1877 = vrcp.f32 %v1204_v60 }
 0x9fd   :  { %v1872_v53 = vpop.eup %1871  ;;  %1879 = vrcp.f32 %v1207_v13 }
 0x9fe   :  { %v1335_v15 = vsel %vm243_vm2, %v1872_v53, 0.0  ;;  %v1874_v11 = vpop.eup %1873 }
 0x9ff   :  { %1336 = vadd.xlane.f32.xlu0 %v1335_v15  ;;  %v1050_v57 = vmul.f32 %v1874_v11, %v1862_v25  ;;  %v1471_v11 = vld [vmem:[#allocation14 + $0x10] sm:$0xff] }
 0xa01   :  { %v1876_v63 = vpop.eup %1875 }
 0xa02   :  { %v1789_v17 = vpop.permute.xlu1 %1788  ;;  %v1794_v55 = vpop.permute.xlu2 %1793  ;;  %v1051_v12 = vmul.f32 %v1876_v63, %v1868_v45 }
 0xa03   :  { %v1790_v54 = vunpack.i.l.bf16 %v1789_v17  ;;  %v1791_v56 = vunpack.i.h.bf16 %v1789_v17  ;;  %v1795_v59 = vunpack.i.l.bf16 %v1794_v55  ;;  %v1796_v61 = vunpack.i.h.bf16 %v1794_v55  ;;  %v1878_v58 = vpop.eup %1877  ;;  %v1469_v55 = vld [vmem:[#allocation14] sm:$0xff] }
 0xa04   :  { %v1210_v14 = vmul.f32 %v1878_v58, %v2494_v35  ;;  %v1880_v10 = vpop.eup %1879 }
 0xa05   :  { %1078 = vmatpush.msra.mxu1 %v1790_v54  ;;  %v1211_v4 = vmul.f32 %v1880_v10, %v1866_v2  ;;  %v1470_v54 = vld [vmem:[#allocation14 + $0x8] sm:$0xff] }
 0xa07   :  { %1079 = vmatpush.msra.mxu1 %v1791_v56 }
 0xa08   :  { %1686 = vmatmul.msk.f32.vlgmr.msra.gmra.mxu1 %vm243_vm2, %v1050_v57 }
 0xa09   :  { %1238 = vmatpush.msrb.mxu1 %v1795_v59 }
 0xa0a   :  { %v1799_v62 = vpop.permute.xlu1 %1798  ;;  %v1248_v22 = vpop.permute.xlu2 %1247 }
 0xa0b   :  { %v1800_v7 = vunpack.i.l.bf16 %v1799_v62  ;;  %1239 = vmatpush.msrb.mxu1 %v1796_v61  ;;  %v1801_v8 = vunpack.i.h.bf16 %v1799_v62 }
 0xa0d   :  { %1368 = vmatpush.msrb.mxu0 %v1800_v7 }
 0xa0f   :  { %1369 = vmatpush.msrb.mxu0 %v1801_v8 }
 0xa10   :  { %1687 = vmatmul.msk.f32.gmra.mxu1 %vm243_vm2, %v1051_v12 }
 0xa12   :  { %v1088_v19 = vpop.permute.xlu1 %1087 }
 0xa13   :  { %1377 = vrot.lane.b32.xlu0 %v2376_v18, %s2143_s0  ;;  %1111 = vmatpush.msra.mxu3 %v1088_v19 }
 0xa15   :  { %1271 = vmatpush.msrb.mxu3 %v1248_v22 }
 0xa18   :  { %1696 = vmatmul.msk.f32.vlgmr.msrb.gmra.mxu1 %vm243_vm2, %v1210_v14 }
 0xa20   :  { %1697 = vmatmul.msk.f32.gmra.mxu1 %vm243_vm2, %v1211_v4  ;;  %v1809_v4 = vld [vmem:[#allocation15 + $0x9] ss:$0 sm:$0xff] }
 0xa6a   :  { %v1334_v20 = vpop.xlane.xlu0 %1333 }
 0xa6b   :  { %1881 = vrcp.f32 %v1334_v20 }
 0xa71   :  { %v1882_v5 = vpop.eup %1881 }
 0xa72   :  { %v1340_v25 = vmul.f32 %v1882_v5, %v1870_v39  ;;  %v1337_v26 = vpop.xlane.xlu0 %1336  ;;  %v1810_v5 = vld [vmem:[#allocation15 + $0xa] ss:$0 sm:$0xff] }
 0xa73   :  { %1883 = vrcp.f32 %v1337_v26 }
 0xa74   :  { %1704 = vmatmul.msk.f32.vlgmr.msrb.gmra.mxu0 %vm243_vm2, %v1340_v25 }
 0xa79   :  { %v1884_v18 = vpop.eup %1883 }
 0xa7a   :  { %v1341_v28 = vmul.f32 %v1884_v18, %v1872_v53 }
 0xa7c   :  { %1705 = vmatmul.msk.f32.gmra.mxu0 %vm243_vm2, %v1341_v28 }
 0xa85   :  { %v1081_v30 = vpop.f32.mrf.mxu1  ;;  %v1378_v0 = vpop.permute.xlu0 %1377 }
 0xa86   :  { %1688 = vmatmul.msk.f32.vlgmr.msra.gmra.mxu3 %vm166_vm1, %v1081_v30  ;;  %1401 = vmatpush.msra.mxu1 %v1378_v0 }
 0xa8d   :  { %v1084_v1 = vpop.f32.mrf.mxu1 }
 0xa8e   :  { %1689 = vmatmul.msk.f32.gmra.mxu3 %vm166_vm1, %v1084_v1 }
 0xa95   :  { %v1241_v31 = vpop.f32.mrf.mxu1 }
 0xa96   :  { %1698 = vmatmul.msk.f32.vlgmr.msrb.gmra.mxu3 %vm166_vm1, %v1241_v31 }
 0xa9d   :  { %v1244_v32 = vpop.f32.mrf.mxu1 }
 0xa9e   :  { %1699 = vmatmul.msk.f32.gmra.mxu3 %vm166_vm1, %v1244_v32 }
 0xaf1   :  { %v1371_v33 = vpop.f32.mrf.mxu0 }
 0xaf2   :  { %1706 = vmatmul.msk.f32.vlgmr.msra.gmra.mxu1 %vm166_vm1, %v1371_v33 }
 0xaf9   :  { %v1374_v34 = vpop.f32.mrf.mxu0 }
 0xafa   :  { %1707 = vmatmul.msk.f32.gmra.mxu1 %vm166_vm1, %v1374_v34  ;;  %vm1520_vm1 = vcmask 523264  }
 0xb09   :  { %v1113_v35 = vpop.f32.mrf.mxu3 }
 0xb0a   :  { %v1146_v40 = vadd.f32 %v2488_v24, %v1113_v35 }
 0xb11   :  { %v1116_v37 = vpop.f32.mrf.mxu3 }
 0xb12   :  { %v1149_v3 = vadd.f32 %v2491_v21, %v1116_v37 }
 0xb19   :  { %v1273_v38 = vpop.f32.mrf.mxu3 }
 0xb1a   :  { %v1279_v41 = vadd.f32 %v1273_v38, %v1146_v40  ;;  %v1811_v38 = vld [vmem:[#allocation15 + $0x5] ss:$0 sm:$0xff] }
 0xb21   :  { %v1276_v27 = vpop.f32.mrf.mxu3 }
 0xb22   :  { %v1280_v29 = vadd.f32 %v1276_v27, %v1149_v3  ;;  %v1812_v27 = vld [vmem:[#allocation15 + $0x6] ss:$0 sm:$0xff] }
 0xb6f   :  { %v1403_v43 = vpop.f32.mrf.mxu1 }
 0xb70   :  { %v1409_v44 = vadd.f32 %v1403_v43, %v1279_v41 }
 0xb72   :  { %v1413_v2 = vadd.f32 %v1808_v42, %v1409_v44 }
 0xb74   :  { %v1415_v45 = vadd.f32 %v1413_v2, %v2428_v6 }
 0xb76   :  { %v1419_v36 = vsel %vm176_vm0, %v1415_v45, 0.0 }
 0xb77   :  { %1420 = vadd.xlane.f32.xlu1 %v1419_v36  ;;  %v1406_v46 = vpop.f32.mrf.mxu1 }
 0xb78   :  { %v1410_v47 = vadd.f32 %v1406_v46, %v1280_v29 }
 0xb7a   :  { %v1414_v48 = vadd.f32 %v1808_v42, %v1410_v47 }
 0xb7c   :  { %v1416_v49 = vadd.f32 %v1414_v48, %v2432_v9  ;;  %v1472_v9 = vld [vmem:[#allocation14 + $0x18] sm:$0xff] }
 0xb7d   :  { %1493 = vmatpush.msra.mxu3 %v1472_v9 }
 0xb7e   :  { %v1422_v24 = vsel %vm176_vm0, %v1416_v49, 0.0 }
 0xb7f   :  { %1423 = vadd.xlane.f32.xlu2 %v1422_v24  ;;  %1494 = vmatpush.msra.mxu3 %v1471_v11 }
 0xb81   :  { %1495 = vmatpush.msra.mxu3 %v1470_v54 }
 0xb83   :  { %1496 = vmatpush.msra.mxu3 %v1469_v55 }
 0xb97   :  { %1518 = vrot.lane.b32.xlu2 %v1472_v9, %s2136_s22 }
 0xb9f   :  { %1512 = vrot.lane.b32.xlu2 %v1469_v55, %s2136_s22 }
 0xbea   :  { %v1421_v39 = vpop.xlane.xlu1 %1420 }
 0xbeb   :  { %v1425_v50 = vmul.f32 %v1421_v39, %v2415_v23 }
 0xbed   :  { %v1427_v51 = vsub.f32 %v1415_v45, %v1425_v50 }
 0xbef   :  { %v1429_v52 = vmul.f32 %v1427_v51, %v1427_v51 }
 0xbf1   :  { %v1431_v21 = vsel %vm176_vm0, %v1429_v52, 0.0 }
 0xbf2   :  { %1432 = vadd.xlane.f32.xlu0 %v1431_v21  ;;  %v1424_v6 = vpop.xlane.xlu2 %1423 }
 0xbf3   :  { %v1426_v16 = vmul.f32 %v1424_v6, %v2415_v23 }
 0xbf5   :  { %v1428_v53 = vsub.f32 %v1416_v49, %v1426_v16 }
 0xbf7   :  { %v1430_v15 = vmul.f32 %v1428_v53, %v1428_v53 }
 0xbf9   :  { %v1434_v17 = vsel %vm176_vm0, %v1430_v15, 0.0 }
 0xbfa   :  { %1435 = vadd.xlane.f32.xlu1 %v1434_v17  ;;  %v1519_v33 = vpop.permute.xlu2 %1518 }
 0xbfb   :  { %1710 = vmatpush.xpose.msk.msrb.mxu2 %vm1520_vm1, %v1519_v33 }
 0xc02   :  { %v1513_v37 = vpop.permute.xlu2 %1512 }
 0xc06   :  { %1514 = vrot.lane.b32.xlu0 %v1470_v54, %s2136_s22 }
 0xc13   :  { %1516 = vrot.lane.b32.xlu1 %v1471_v11, %s2136_s22 }
 0xc65   :  { %v1433_v56 = vpop.xlane.xlu0 %1432 }
 0xc66   :  { %v1437_v57 = vmul.f32 %v1433_v56, %v2415_v23 }
 0xc68   :  { %v1439_v59 = vadd.f32 1e-05, %v1437_v57 }
 0xc6a   :  { %1885 = vrsqrt.f32 %v1439_v59  ;;  %vm1447_vm11 = vweird.f32 %v1439_v59 }
 0xc6d   :  { %v1436_v60 = vpop.xlane.xlu1 %1435 }
 0xc6e   :  { %v1438_v61 = vmul.f32 %v1436_v60, %v2415_v23 }
 0xc70   :  { %v1886_v62 = vpop.eup %1885  ;;  %v1440_v63 = vadd.f32 1e-05, %v1438_v61 }
 0xc71   :  { %v1442_v7 = vmul.f32 %v1886_v62, %v1439_v59  ;;  %vm1448_vm10 = vweird.f32 %v1886_v62 }
 0xc72   :  { %1887 = vrsqrt.f32 %v1440_v63  ;;  %vm1449_vm12 = vmor %vm1447_vm11, %vm1448_vm10  ;;  %vm1457_vm14 = vweird.f32 %v1440_v63 }
 0xc73   :  { %v1443_v8 = vmul.f32 %v1886_v62, %v1442_v7 }
 0xc75   :  { %v1444_v12 = vmul.f32 0.5, %v1443_v8 }
 0xc77   :  { %v1445_v13 = vsub.f32 1.5, %v1444_v12  ;;  %v1813_v12 = vld [vmem:[#allocation15 + $0xb] ss:$0 sm:$0xff] }
 0xc78   :  { %v1888_v58 = vpop.eup %1887  ;;  %v1515_v35 = vpop.permute.xlu0 %1514 }
 0xc79   :  { %v1446_v14 = vmul.f32 %v1886_v62, %v1445_v13  ;;  %v1452_v10 = vmul.f32 %v1888_v58, %v1440_v63  ;;  %vm1458_vm13 = vweird.f32 %v1888_v58 }
 0xc7a   :  { %vm1459_vm15 = vmor %vm1457_vm14, %vm1458_vm13 }
 0xc7b   :  { %v1450_v19 = vsel %vm1449_vm12, %v1886_v62, %v1446_v14  ;;  %v1453_v20 = vmul.f32 %v1888_v58, %v1452_v10  ;;  %v1814_v10 = vld [vmem:[#allocation15 + $0xc] ss:$0 sm:$0xff] }
 0xc7c   :  { %v1461_v22 = vmul.f32 %v1450_v19, %v1427_v51 }
 0xc7d   :  { %v1454_v25 = vmul.f32 0.5, %v1453_v20 }
 0xc7e   :  { %v1464_v26 = vmul.f32 %v1809_v4, %v1461_v22 }
 0xc7f   :  { %v1455_v18 = vsub.f32 1.5, %v1454_v25 }
 0xc80   :  { %v1467_v28 = vadd.f32 %v1810_v5, %v1464_v26 }
 0xc81   :  { %v1456_v30 = vmul.f32 %v1888_v58, %v1455_v18 }
 0xc82   :  { %1708 = vmatmul.msk.f32.vlgmr.msra.gmra.mxu3 %vm176_vm0, %v1467_v28 }
 0xc83   :  { %v1460_v0 = vsel %vm1459_vm15, %v1888_v58, %v1456_v30 }
 0xc84   :  { %v1462_v1 = vmul.f32 %v1460_v0, %v1428_v53 }
 0xc85   :  { %v1517_v34 = vpop.permute.xlu1 %1516 }
 0xc86   :  { %v1465_v31 = vmul.f32 %v1809_v4, %v1462_v1  ;;  %1711 = vmatpush.xpose.msk.msrb.mxu2 %vm1520_vm1, %v1517_v34 }
 0xc88   :  { %v1468_v32 = vadd.f32 %v1810_v5, %v1465_v31 }
 0xc8a   :  { %1709 = vmatmul.msk.f32.gmra.mxu3 %vm176_vm0, %v1468_v32  ;;  %1712 = vmatpush.xpose.msk.msrb.mxu2 %vm1520_vm1, %v1515_v35 }
 0xc8e   :  { %1713 = vmatpush.xpose.msk.msrb.mxu2 %vm1520_vm1, %v1513_v37 }
 0xd05   :  { %v1498_v40 = vpop.f32.mrf.mxu3 }
 0xd06   :  { %v1499_v41 = vadd.f32 %v1811_v38, %v1498_v40 }
 0xd08   :  { %v1504_v42 = vmax.f32 %v1499_v41, 0.0 }
 0xd0a   :  { %1714 = vmatmul.msk.f32.vlgmr.msrb.gmra.mxu2 %vm1520_vm1, %v1504_v42 }
 0xd0d   :  { %v1501_v43 = vpop.f32.mrf.mxu3 }
 0xd0e   :  { %v1502_v44 = vadd.f32 %v1811_v38, %v1501_v43 }
 0xd10   :  { %v1505_v2 = vmax.f32 %v1502_v44, 0.0 }
 0xd12   :  { %1715 = vmatmul.msk.f32.gmra.mxu2 %vm1520_vm1, %v1505_v2 }
 0xd8d   :  { %v1552_v3 = vpop.f32.mrf.mxu2 }
 0xd8e   :  { %v1553_v45 = vadd.f32 %v1812_v27, %v1552_v3 }
 0xd90   :  { %v1558_v29 = vadd.f32 %v1553_v45, %v1467_v28 }
 0xd92   :  { %v1562_v36 = vsel %vm176_vm0, %v1558_v29, 0.0 }
 0xd93   :  { %1563 = vadd.xlane.f32.xlu1 %v1562_v36 }
 0xd95   :  { %v1555_v46 = vpop.f32.mrf.mxu2 }
 0xd96   :  { %v1556_v47 = vadd.f32 %v1812_v27, %v1555_v46 }
 0xd98   :  { %v1559_v48 = vadd.f32 %v1556_v47, %v1468_v32 }
 0xd9a   :  { %v1565_v49 = vsel %vm176_vm0, %v1559_v48, 0.0 }
 0xd9b   :  { %1566 = vadd.xlane.f32.xlu2 %v1565_v49 }
 0xe06   :  { %v1564_v24 = vpop.xlane.xlu1 %1563 }
 0xe07   :  { %v1568_v39 = vmul.f32 %v1564_v24, %v2415_v23 }
 0xe09   :  { %v1570_v50 = vsub.f32 %v1558_v29, %v1568_v39 }
 0xe0b   :  { %v1572_v51 = vmul.f32 %v1570_v50, %v1570_v50 }
 0xe0d   :  { %v1574_v52 = vsel %vm176_vm0, %v1572_v51, 0.0 }
 0xe0e   :  { %v1567_v21 = vpop.xlane.xlu2 %1566  ;;  %1575 = vadd.xlane.f32.xlu0 %v1574_v52 }
 0xe0f   :  { %v1569_v6 = vmul.f32 %v1567_v21, %v2415_v23 }
 0xe11   :  { %v1571_v16 = vsub.f32 %v1559_v48, %v1569_v6 }
 0xe13   :  { %v1573_v53 = vmul.f32 %v1571_v16, %v1571_v16 }
 0xe15   :  { %v1577_v15 = vsel %vm176_vm0, %v1573_v53, 0.0 }
 0xe16   :  { %1578 = vadd.xlane.f32.xlu1 %v1577_v15 }
 0xe81   :  { %v1576_v17 = vpop.xlane.xlu0 %1575 }
 0xe82   :  { %v1580_v9 = vmul.f32 %v1576_v17, %v2415_v23 }
 0xe84   :  { %v1582_v11 = vadd.f32 1e-05, %v1580_v9 }
 0xe86   :  { %1889 = vrsqrt.f32 %v1582_v11  ;;  %vm1590_vm3 = vweird.f32 %v1582_v11 }
 0xe89   :  { %v1579_v54 = vpop.xlane.xlu1 %1578 }
 0xe8a   :  { %v1581_v55 = vmul.f32 %v1579_v54, %v2415_v23 }
 0xe8c   :  { %v1890_v56 = vpop.eup %1889  ;;  %v1583_v57 = vadd.f32 1e-05, %v1581_v55 }
 0xe8d   :  { %v1585_v59 = vmul.f32 %v1890_v56, %v1582_v11  ;;  %vm1591_vm2 = vweird.f32 %v1890_v56 }
 0xe8e   :  { %1891 = vrsqrt.f32 %v1583_v57  ;;  %vm1592_vm4 = vmor %vm1590_vm3, %vm1591_vm2  ;;  %vm1600_vm6 = vweird.f32 %v1583_v57 }
 0xe8f   :  { %v1586_v60 = vmul.f32 %v1890_v56, %v1585_v59 }
 0xe91   :  { %v1587_v61 = vmul.f32 0.5, %v1586_v60 }
 0xe93   :  { %v1588_v62 = vsub.f32 1.5, %v1587_v61 }
 0xe94   :  { %v1892_v63 = vpop.eup %1891 }
 0xe95   :  { %v1589_v7 = vmul.f32 %v1890_v56, %v1588_v62  ;;  %v1595_v8 = vmul.f32 %v1892_v63, %v1583_v57  ;;  %vm1601_vm5 = vweird.f32 %v1892_v63 }
 0xe96   :  { %vm1602_vm7 = vmor %vm1600_vm6, %vm1601_vm5 }
 0xe97   :  { %v1593_v13 = vsel %vm1592_vm4, %v1890_v56, %v1589_v7  ;;  %v1596_v58 = vmul.f32 %v1892_v63, %v1595_v8 }
 0xe98   :  { %v1604_v14 = vmul.f32 %v1593_v13, %v1570_v50 }
 0xe99   :  { %v1597_v4 = vmul.f32 0.5, %v1596_v58 }
 0xe9a   :  { %v1607_v23 = vmul.f32 %v1813_v12, %v1604_v14 }
 0xe9b   :  { %v1598_v19 = vsub.f32 1.5, %v1597_v4 }
 0xe9c   :  { %v1610_v20 = vadd.f32 %v1814_v10, %v1607_v23 }
 0xe9d   :  { %v1599_v22 = vmul.f32 %v1892_v63, %v1598_v19 }
 0xe9e   :  { %1612 = vst.msk [vmem:[#allocation17] sm:$0xff] %vm176_vm0, %v1610_v20 }
 0xe9f   :  { %v1603_v5 = vsel %vm1602_vm7, %v1892_v63, %v1599_v22 }
 0xea0   :  { %v1605_v25 = vmul.f32 %v1603_v5, %v1571_v16 }
 0xea2   :  { %v1608_v26 = vmul.f32 %v1813_v12, %v1605_v25 }
 0xea4   :  { %v1611_v18 = vadd.f32 %v1814_v10, %v1608_v26 }
 0xea6   :  { %1614 = vst.msk [vmem:[#allocation17 + $0x8] sm:$0xff] %vm176_vm0, %v1611_v18 }
 0xea7   :  { %1627 = dma.vmem_to_hbm [thread:$0]  %s1620_s28, 256, %s1622_s9, [#allocation5], %s2122_s13, %s2122_s13, %s2123_s14  }
 0xea8   :  { %2119 = dma.done.wait [#allocation5], 256  }
 0xea9   :  { %2120 = vsyncadd [#allocation5], 4294967040 }
 0xeaa   :  { %1632 = vsyncpa [#allocation4], 1 }
 0xeab   :  { %1633 = vsyncpa [#allocation7], 1 }
 0xeac   :  { %1634 = vsyncpa [#allocation10], 1 }
 0xead   :  { %1635 = vsyncpa [#allocation13], 1 }
 0xeae   :  { %1636 = vsyncpa [#allocation16], 1 }
 0xeaf   :  { %1637 = vsyncpa [#allocation5], 1 }

</bundles_post_ra>
